<compile_context>
chip_gen: v5e
topology: v5e:2x2
jax: 0.10.0
libtpu: 0.0.40
codegen_flags: <defaults>
</compile_context>

<pallas_src>
import math

import jax
import jax.numpy as jnp
from jax import lax
from jax.experimental import pallas as pl
from jax.experimental.pallas import tpu as pltpu


# ----------------------------- config ---------------------------------------
class PI0Config:
    max_state_dim = 32
    max_action_dim = 32
    proj_width = 64          # expert / suffix width
    n_action_steps = 8
    img_size = 16
    patch_size = 8
    vocab_size = 128
    lang_len = 8
    hidden_dim = 64          # synthetic paligemma (prefix) width
    n_heads = 2
    head_dim = 32


_NEG_INF = -2.3819763e38


def _round_up(x, m):
    return ((x + m - 1) // m) * m


# ----------------------------- params ----------------------------------------
def init_params(key, cfg):
    assert cfg.hidden_dim == cfg.proj_width, "packed layout assumes D == proj_width"
    D, P = cfg.hidden_dim, cfg.proj_width
    H, Dh = cfg.n_heads, cfg.head_dim
    Sd, Ad = cfg.max_state_dim, cfg.max_action_dim
    patch_dim = 3 * cfg.patch_size * cfg.patch_size
    sqrt_d = math.sqrt(D)

    def w(k, shape, scale=0.02):
        return jax.random.normal(k, shape, jnp.float32) * scale

    keys = jax.random.split(key, 16)

    # sinusoidal time embedding as sin(freq * t + phase) == [sin(f t), cos(f t)]
    # (avoids an in-kernel lane concat).
    frac = jnp.linspace(0.0, 1.0, P // 2, dtype=jnp.float32)
    period = 0.004 * (4.0 / 0.004) ** frac
    f = (1.0 / period) * 2.0 * math.pi
    freq_full = jnp.concatenate([f, f])
    phase_full = jnp.concatenate([jnp.zeros((P // 2,), jnp.float32),
                                  jnp.full((P // 2,), 0.5 * math.pi, jnp.float32)])

    patch_b = w(keys[1], (P,)) * sqrt_d          # sqrt(D) scale folded in
    state_b = w(keys[3], (P,))
    act_in_b = w(keys[5], (P,))
    mlp_in_b = w(keys[7], (P,))
    mlp_out_b = w(keys[9], (P,))
    act_out_b = w(keys[11], (Ad,))
    biases = jnp.stack([
        patch_b, state_b, act_in_b, mlp_in_b, mlp_out_b,
        freq_full, phase_full,
        jnp.concatenate([act_out_b, jnp.zeros((P - Ad,), jnp.float32)]),
    ], axis=0)                                   # (8, P) f32 -> single DMA

    return {
        # sqrt(hidden_dim) embedding scale folded into the weights at init.
        "tok_emb": w(keys[0], (cfg.vocab_size, D)) * sqrt_d,               # f32 (wrapper gather)
        "patch_w": (w(keys[2], (patch_dim, D)) * sqrt_d).astype(jnp.bfloat16),
        # [state_proj ; action_in_proj] stacked along rows (aligned row slices in-kernel).
        "inproj_w": jnp.concatenate([w(keys[4], (Sd, P)), w(keys[6], (Ad, P))],
                                    axis=0).astype(jnp.bfloat16),
        # [mlp_in_w(action half), mlp_in_w(time half), mlp_out_w]  (concat -> two GEMMs)
        "mlp_w": w(keys[8], (3, P, P)).astype(jnp.bfloat16),
        # synthetic joint-attention weights, PRE-SPLIT PER HEAD at init:
        #   per head: [Wk_prefix, Wv_prefix, Wq_suffix, Wk_suffix, Wv_suffix]
        "attn_in_w": w(keys[10], (H * 5, P, Dh)).astype(jnp.bfloat16),
        "attn_out_w": w(keys[12], (H, Dh, P)).astype(jnp.bfloat16),
        "act_out_w": w(keys[13], (P, Ad)).astype(jnp.bfloat16),
        "biases": biases,
    }


# ----------------------------- fused forward ---------------------------------
def pi0_forward(params, cfg, images, img_masks, lang_tokens, lang_masks,
                state, actions, noise, time):
    B = state.shape[0]
    ps = cfg.patch_size
    A = cfg.n_action_steps
    P = cfg.proj_width
    H, Dh = cfg.n_heads, cfg.head_dim
    Sd, Ad = cfg.max_state_dim, cfg.max_action_dim

    # ---- tiny wrapper-side layout plumbing (no heavy compute, no extra pallas_call) ----
    patch_list, img_pad_list = [], []
    for img, m in zip(images, img_masks):
        _, C, Hh, Ww = img.shape
        p = img.reshape(B, C, Hh // ps, ps, Ww // ps, ps)
        p = p.transpose(0, 2, 4, 1, 3, 5).reshape(B, (Hh // ps) * (Ww // ps), C * ps * ps)
        patch_list.append(p.astype(jnp.float32))
        img_pad_list.append(jnp.broadcast_to(m[:, None].astype(jnp.float32), (B, p.shape[1])))
    patches = jnp.concatenate(patch_list, axis=1)              # (B, Np, patch_dim)
    img_pad = jnp.concatenate(img_pad_list, axis=1)
    Np = patches.shape[1]

    # language token embedding (tiny XLA gather; sqrt(D) scale already folded into tok_emb)
    lang_emb = jnp.take(params["tok_emb"], lang_tokens, axis=0)  # (B, L, D)
    L = lang_emb.shape[1]

    # static padded joint layout: [ lang(L) | img(Np) | pad | actions(A) | state(1) | pad ]
    n_pref = L + Np
    PREF_PAD = _round_up(n_pref, 8)
    SUF_PAD = _round_up(A + 1, 8)
    S_PAD = PREF_PAD + SUF_PAD
    STATE_POS = PREF_PAD + A
    scale = 1.0 / math.sqrt(Dh)

    pad_vec = jnp.concatenate([
        lang_masks.astype(jnp.float32),
        img_pad,
        jnp.zeros((B, PREF_PAD - n_pref), jnp.float32),
        jnp.ones((B, A + 1), jnp.float32),
        jnp.zeros((B, SUF_PAD - A - 1), jnp.float32),
    ], axis=1).reshape(B, 1, S_PAD)

    state3 = state.astype(jnp.float32).reshape(B, 1, Sd)
    time3 = time.astype(jnp.float32).reshape(B, 1, 1)
    actions = actions.astype(jnp.float32)
    noise = noise.astype(jnp.float32)

    def kernel(patches_ref, lang_ref, pad_ref, state_ref, act_ref, noise_ref, time_ref,
               patch_w_ref, inproj_w_ref, mlp_w_ref, attn_in_w_ref, attn_out_w_ref,
               act_out_w_ref, bias_ref,
               loss_ref,
               x_buf, k_buf, v_buf):
        f32 = jnp.float32
        bf16 = jnp.bfloat16

        # ---------------- flow-matching targets (fused, no HBM round trip) ----------------
        t = time_ref[0]                                          # (1, 1)
        acts = act_ref[0]                                        # (A, Ad)
        nz = noise_ref[0]
        x_t = t * nz + (1.0 - t) * acts
        u_t = nz - acts

        # ---------------- prefix embedding (patch-embed GEMM) ----------------
        img_emb = jnp.dot(patches_ref[0].astype(bf16), patch_w_ref[...],
                          preferred_element_type=f32) + bias_ref[0:1, :]

        # ---------------- suffix embedding (state/action proj + time MLP) ----------------
        state_emb = jnp.dot(state_ref[0].astype(bf16), inproj_w_ref[0:Sd, :],
                            preferred_element_type=f32) + bias_ref[1:2, :]
        action_emb = jnp.dot(x_t.astype(bf16), inproj_w_ref[Sd:Sd + Ad, :],
                             preferred_element_type=f32) + bias_ref[2:3, :]
        time_emb = jnp.sin(bias_ref[5:6, :] * t + bias_ref[6:7, :])          # (1, P)
        # concat([action_emb, time_emb]) @ mlp_in  ==  action_emb @ W_a + time_emb @ W_t
        te_proj = jnp.dot(time_emb.astype(bf16), mlp_w_ref[1], preferred_element_type=f32)
        h = jnp.dot(action_emb.astype(bf16), mlp_w_ref[0], preferred_element_type=f32)
        h = h + te_proj + bias_ref[3:4, :]
        h = h * (1.0 / (1.0 + jnp.exp(-h)))                                  # SiLU (f32)
        at_emb = (jnp.dot(h.astype(bf16), mlp_w_ref[2], preferred_element_type=f32)
                  + bias_ref[4:5, :])                                        # (A, P)

        # ---------------- joint hidden states in a zero-initialised VMEM scratch ----------
        x_buf[...] = jnp.zeros_like(x_buf)
        x_buf[0:L, :] = lang_ref[0]
        x_buf[L:L + Np, :] = img_emb
        x_buf[PREF_PAD:PREF_PAD + A, :] = at_emb
        x_buf[PREF_PAD + A:PREF_PAD + A + 1, :] = state_emb

        px = x_buf[0:PREF_PAD, :]
        sx = x_buf[PREF_PAD:S_PAD, :]
        px_b = px.astype(bf16)
        sx_b = sx.astype(bf16)

        # attention mask built in-kernel (no [S,S] mask DMA):
        #   key cum: prefix=0, state=1, actions=2 ; query cum: state=1, actions=2
        col = lax.broadcasted_iota(jnp.int32, (SUF_PAD, S_PAD), 1)
        row = lax.broadcasted_iota(jnp.int32, (SUF_PAD, S_PAD), 0)
        cum_j = jnp.where(col < PREF_PAD, 0, jnp.where(col == STATE_POS, 1, 2))
        cum_i = jnp.where(row == A, 1, 2)
        mask = (cum_j <= cum_i) & (pad_ref[0] > 0.5)             # (SUF_PAD, S_PAD)

        # ---------------- joint attention (suffix queries only feed the loss) -------------
        attn = jnp.zeros((SUF_PAD, P), f32)
        for hh in range(H):                                      # static loop, H == 2
            base = hh * 5
            k_buf[hh, 0:PREF_PAD, :] = jnp.dot(px_b, attn_in_w_ref[base + 0],
                                               preferred_element_type=f32)
            v_buf[hh, 0:PREF_PAD, :] = jnp.dot(px_b, attn_in_w_ref[base + 1],
                                               preferred_element_type=f32)
            k_buf[hh, PREF_PAD:S_PAD, :] = jnp.dot(sx_b, attn_in_w_ref[base + 3],
                                                   preferred_element_type=f32)
            v_buf[hh, PREF_PAD:S_PAD, :] = jnp.dot(sx_b, attn_in_w_ref[base + 4],
                                                   preferred_element_type=f32)
            q_h = jnp.dot(sx_b, attn_in_w_ref[base + 2], preferred_element_type=f32)

            s = lax.dot_general(q_h, k_buf[hh], (((1,), (1,)), ((), ())),
                                preferred_element_type=f32) * scale
            s = jnp.where(mask, s, _NEG_INF)
            s = s - jnp.max(s, axis=-1, keepdims=True)
            p = jnp.exp(s)
            p = p / jnp.sum(p, axis=-1, keepdims=True)           # exact softmax
            o_h = jnp.dot(p, v_buf[hh], preferred_element_type=f32)          # (SUF_PAD, Dh)
            attn = attn + jnp.dot(o_h.astype(bf16), attn_out_w_ref[hh],
                                  preferred_element_type=f32)               # per-head accum

        suffix_hidden = sx + attn                                # residual

        # ---------------- action_out_proj + MSE (reduction='none') ----------------
        act_rows = suffix_hidden[0:A, :]                         # action token rows
        v_t = (jnp.dot(act_rows.astype(bf16), act_out_w_ref[...],
                       preferred_element_type=f32) + bias_ref[7:8, 0:Ad])
        d = u_t - v_t
        loss_ref[0] = d * d

    def wfull(arr):
        nd = arr.ndim
        return pl.BlockSpec(arr.shape, lambda b, _n=nd: (0,) * _n)

    def bspec(shape):
        nd = len(shape)
        return pl.BlockSpec((1,) + tuple(shape[1:]), lambda b, _n=nd: (b,) + (0,) * (_n - 1))

    loss = pl.pallas_call(
        kernel,
        out_shape=jax.ShapeDtypeStruct((B, A, Ad), jnp.float32),
        grid=(B,),
        in_specs=[
            bspec(patches.shape), bspec(lang_emb.shape), bspec(pad_vec.shape),
            bspec(state3.shape), bspec(actions.shape), bspec(noise.shape), bspec(time3.shape),
            wfull(params["patch_w"]), wfull(params["inproj_w"]), wfull(params["mlp_w"]),
            wfull(params["attn_in_w"]), wfull(params["attn_out_w"]),
            wfull(params["act_out_w"]), wfull(params["biases"]),
        ],
        out_specs=pl.BlockSpec((1, A, Ad), lambda b: (b, 0, 0)),
        scratch_shapes=[
            pltpu.VMEM((S_PAD, P), jnp.float32),        # joint hidden states
            pltpu.VMEM((H, S_PAD, Dh), jnp.float32),    # per-head K
            pltpu.VMEM((H, S_PAD, Dh), jnp.float32),    # per-head V
        ],
        compiler_params=pltpu.CompilerParams(dimension_semantics=("parallel",)),
    )(patches, lang_emb, pad_vec, state3, actions, noise, time3,
      params["patch_w"], params["inproj_w"], params["mlp_w"],
      params["attn_in_w"], params["attn_out_w"],
      params["act_out_w"], params["biases"])
    return loss


# ----------------------------- main ------------------------------------------
if __name__ == "__main__":
    cfg = PI0Config()
    key = jax.random.PRNGKey(0)
    pkey, dkey = jax.random.split(key)
    params = init_params(pkey, cfg)

    ks = jax.random.split(dkey, 8)
    B = 2
    images = [jax.random.normal(ks[0], (B, 3, cfg.img_size, cfg.img_size), jnp.float32)]
    img_masks = [jnp.ones((B,), dtype=bool)]
    lang_tokens = jax.random.randint(ks[1], (B, cfg.lang_len), 0, cfg.vocab_size)
    lang_masks = jnp.ones((B, cfg.lang_len), dtype=bool)
    state = jax.random.normal(ks[2], (B, cfg.max_state_dim), jnp.float32)
    actions = jax.random.normal(
        ks[3], (B, cfg.n_action_steps, cfg.max_action_dim), jnp.float32)
    noise = jax.random.normal(ks[4], actions.shape, jnp.float32)
    # sample_time: beta(1.5, 1.0) * 0.999 + 0.001 (deterministic via PRNG)
    u1 = jax.random.uniform(ks[5], (B,), jnp.float32)
    u2 = jax.random.uniform(ks[6], (B,), jnp.float32)
    g1 = u1 ** (1.0 / 1.5)
    g2 = u2
    time = (g1 / (g1 + g2)) * 0.999 + 0.001

    fwd = jax.jit(lambda prm, *args: pi0_forward(prm, cfg, *args))
    losses = fwd(params, images, img_masks, lang_tokens, lang_masks,
                 state, actions, noise, time)
    losses = jax.block_until_ready(losses)
    assert losses.shape == (B, cfg.n_action_steps, cfg.max_action_dim)
    assert bool(jnp.isfinite(losses).all())
    print("KERNEL_OK")
</pallas_src>

<mosaic_0001>
module attributes {stable_mosaic.version = 11 : i64} {
  func.func @kernel(%arg0: i32, %arg1: memref<1x4x192xf32, #tpu.memory_space<vmem>>, %arg2: memref<1x8x64xf32, #tpu.memory_space<vmem>>, %arg3: memref<1x1x32xf32, #tpu.memory_space<vmem>>, %arg4: memref<1x1x32xf32, #tpu.memory_space<vmem>>, %arg5: memref<1x8x32xf32, #tpu.memory_space<vmem>>, %arg6: memref<1x8x32xf32, #tpu.memory_space<vmem>>, %arg7: memref<1x1x1xf32, #tpu.memory_space<vmem>>, %arg8: memref<192x64xbf16, #tpu.memory_space<vmem>>, %arg9: memref<64x64xbf16, #tpu.memory_space<vmem>>, %arg10: memref<3x64x64xbf16, #tpu.memory_space<vmem>>, %arg11: memref<10x64x32xbf16, #tpu.memory_space<vmem>>, %arg12: memref<2x32x64xbf16, #tpu.memory_space<vmem>>, %arg13: memref<64x32xbf16, #tpu.memory_space<vmem>>, %arg14: memref<8x64xf32, #tpu.memory_space<vmem>>, %arg15: memref<1x8x32xf32, #tpu.memory_space<vmem>>, %arg16: memref<32x64xf32, #tpu.memory_space<vmem>>, %arg17: memref<2x32x32xf32, #tpu.memory_space<vmem>>, %arg18: memref<2x32x32xf32, #tpu.memory_space<vmem>>) attributes {dimension_semantics = [#tpu.dimension_semantics<parallel>], iteration_bounds = array<i64: 2>, scalar_prefetch = 0 : i64, scratch_operands = 3 : i64, tpu.core_type = #tpu.core_type<tc>, window_params = [{transform_indices = @transform_0, window_bounds = array<i64: 1, 4, 192>}, {transform_indices = @transform_1, window_bounds = array<i64: 1, 8, 64>}, {transform_indices = @transform_2, window_bounds = array<i64: 1, 1, 32>}, {transform_indices = @transform_3, window_bounds = array<i64: 1, 1, 32>}, {transform_indices = @transform_4, window_bounds = array<i64: 1, 8, 32>}, {transform_indices = @transform_5, window_bounds = array<i64: 1, 8, 32>}, {transform_indices = @transform_6, window_bounds = array<i64: 1, 1, 1>}, {pipeline_mode = #tpu.pipeline_mode<synchronous>, transform_indices = @transform_7, window_bounds = array<i64: 192, 64>}, {pipeline_mode = #tpu.pipeline_mode<synchronous>, transform_indices = @transform_8, window_bounds = array<i64: 64, 64>}, {pipeline_mode = #tpu.pipeline_mode<synchronous>, transform_indices = @transform_9, window_bounds = array<i64: 3, 64, 64>}, {pipeline_mode = #tpu.pipeline_mode<synchronous>, transform_indices = @transform_10, window_bounds = array<i64: 10, 64, 32>}, {pipeline_mode = #tpu.pipeline_mode<synchronous>, transform_indices = @transform_11, window_bounds = array<i64: 2, 32, 64>}, {pipeline_mode = #tpu.pipeline_mode<synchronous>, transform_indices = @transform_12, window_bounds = array<i64: 64, 32>}, {pipeline_mode = #tpu.pipeline_mode<synchronous>, transform_indices = @transform_13, window_bounds = array<i64: 8, 64>}, {transform_indices = @transform_14, window_bounds = array<i64: 1, 8, 32>}]} {
    %c0 = arith.constant 0 : index
    %c0_0 = arith.constant 0 : index
    %c0_1 = arith.constant 0 : index
    %0 = vector.load %arg7[%c0, %c0_0, %c0_1] : memref<1x1x1xf32, #tpu.memory_space<vmem>>, vector<1x1x1xf32>
    %1 = vector.shape_cast %0 : vector<1x1x1xf32> to vector<1x1xf32>
    %c0_2 = arith.constant 0 : index
    %c0_3 = arith.constant 0 : index
    %c0_4 = arith.constant 0 : index
    %2 = vector.load %arg5[%c0_2, %c0_3, %c0_4] : memref<1x8x32xf32, #tpu.memory_space<vmem>>, vector<1x8x32xf32>
    %3 = vector.shape_cast %2 : vector<1x8x32xf32> to vector<8x32xf32>
    %c0_5 = arith.constant 0 : index
    %c0_6 = arith.constant 0 : index
    %c0_7 = arith.constant 0 : index
    %4 = vector.load %arg6[%c0_5, %c0_6, %c0_7] : memref<1x8x32xf32, #tpu.memory_space<vmem>>, vector<1x8x32xf32>
    %5 = vector.shape_cast %4 : vector<1x8x32xf32> to vector<8x32xf32>
    %6 = vector.broadcast %1 : vector<1x1xf32> to vector<8x32xf32>
    %7 = arith.mulf %6, %5 : vector<8x32xf32>
    %cst = arith.constant 1.000000e+00 : f32
    %8 = vector.broadcast %cst : f32 to vector<1x1xf32>
    %9 = arith.subf %8, %1 : vector<1x1xf32>
    %10 = vector.broadcast %9 : vector<1x1xf32> to vector<8x32xf32>
    %11 = arith.mulf %10, %3 : vector<8x32xf32>
    %12 = arith.addf %7, %11 : vector<8x32xf32>
    %13 = arith.subf %5, %3 : vector<8x32xf32>
    %c0_8 = arith.constant 0 : index
    %c0_9 = arith.constant 0 : index
    %c0_10 = arith.constant 0 : index
    %14 = vector.load %arg1[%c0_8, %c0_9, %c0_10] : memref<1x4x192xf32, #tpu.memory_space<vmem>>, vector<1x4x192xf32>
    %15 = vector.shape_cast %14 : vector<1x4x192xf32> to vector<4x192xf32>
    %16 = arith.truncf %15 : vector<4x192xf32> to vector<4x192xbf16>
    %c0_11 = arith.constant 0 : index
    %c0_12 = arith.constant 0 : index
    %17 = vector.load %arg8[%c0_11, %c0_12] : memref<192x64xbf16, #tpu.memory_space<vmem>>, vector<192x64xbf16>
    %cst_13 = arith.constant dense<0.000000e+00> : vector<4x64xf32>
    %18 = tpu.matmul %16, %17, %cst_13 {dimension_numbers = #tpu.dot_dimension_numbers<[1], [0], [0], [1], [0, 0, 1, 1], [], []>} : vector<4x192xbf16>, vector<192x64xbf16>, vector<4x64xf32> -> vector<4x64xf32>
    %c0_14 = arith.constant 0 : index
    %c0_15 = arith.constant 0 : index
    %19 = vector.load %arg14[%c0_14, %c0_15] : memref<8x64xf32, #tpu.memory_space<vmem>>, vector<1x64xf32>
    %20 = vector.broadcast %19 : vector<1x64xf32> to vector<4x64xf32>
    %21 = arith.addf %18, %20 : vector<4x64xf32>
    %c0_16 = arith.constant 0 : index
    %c0_17 = arith.constant 0 : index
    %c0_18 = arith.constant 0 : index
    %22 = vector.load %arg4[%c0_16, %c0_17, %c0_18] : memref<1x1x32xf32, #tpu.memory_space<vmem>>, vector<1x1x32xf32>
    %23 = vector.shape_cast %22 : vector<1x1x32xf32> to vector<1x32xf32>
    %24 = arith.truncf %23 : vector<1x32xf32> to vector<1x32xbf16>
    %c0_19 = arith.constant 0 : index
    %c0_20 = arith.constant 0 : index
    %25 = vector.load %arg9[%c0_19, %c0_20] : memref<64x64xbf16, #tpu.memory_space<vmem>>, vector<32x64xbf16>
    %cst_21 = arith.constant dense<0.000000e+00> : vector<1x64xf32>
    %26 = tpu.matmul %24, %25, %cst_21 {dimension_numbers = #tpu.dot_dimension_numbers<[1], [0], [0], [1], [0, 0, 1, 1], [], []>} : vector<1x32xbf16>, vector<32x64xbf16>, vector<1x64xf32> -> vector<1x64xf32>
    %c1 = arith.constant 1 : index
    %c0_22 = arith.constant 0 : index
    %27 = vector.load %arg14[%c1, %c0_22] : memref<8x64xf32, #tpu.memory_space<vmem>>, vector<1x64xf32>
    %28 = arith.addf %26, %27 : vector<1x64xf32>
    %29 = arith.truncf %12 : vector<8x32xf32> to vector<8x32xbf16>
    %c32 = arith.constant 32 : index
    %c0_23 = arith.constant 0 : index
    %30 = vector.load %arg9[%c32, %c0_23] : memref<64x64xbf16, #tpu.memory_space<vmem>>, vector<32x64xbf16>
    %cst_24 = arith.constant dense<0.000000e+00> : vector<8x64xf32>
    %31 = tpu.matmul %29, %30, %cst_24 {dimension_numbers = #tpu.dot_dimension_numbers<[1], [0], [0], [1], [0, 0, 1, 1], [], []>} : vector<8x32xbf16>, vector<32x64xbf16>, vector<8x64xf32> -> vector<8x64xf32>
    %c2 = arith.constant 2 : index
    %c0_25 = arith.constant 0 : index
    %32 = vector.load %arg14[%c2, %c0_25] : memref<8x64xf32, #tpu.memory_space<vmem>>, vector<1x64xf32>
    %33 = vector.broadcast %32 : vector<1x64xf32> to vector<8x64xf32>
    %34 = arith.addf %31, %33 : vector<8x64xf32>
    %c5 = arith.constant 5 : index
    %c0_26 = arith.constant 0 : index
    %35 = vector.load %arg14[%c5, %c0_26] : memref<8x64xf32, #tpu.memory_space<vmem>>, vector<1x64xf32>
    %36 = vector.broadcast %1 : vector<1x1xf32> to vector<1x64xf32>
    %37 = arith.mulf %35, %36 : vector<1x64xf32>
    %c6 = arith.constant 6 : index
    %c0_27 = arith.constant 0 : index
    %38 = vector.load %arg14[%c6, %c0_27] : memref<8x64xf32, #tpu.memory_space<vmem>>, vector<1x64xf32>
    %39 = arith.addf %37, %38 : vector<1x64xf32>
    %40 = math.sin %39 : vector<1x64xf32>
    %41 = arith.truncf %40 : vector<1x64xf32> to vector<1x64xbf16>
    %c1_28 = arith.constant 1 : index
    %c0_29 = arith.constant 0 : index
    %c0_30 = arith.constant 0 : index
    %42 = vector.load %arg10[%c1_28, %c0_29, %c0_30] : memref<3x64x64xbf16, #tpu.memory_space<vmem>>, vector<1x64x64xbf16>
    %43 = vector.shape_cast %42 : vector<1x64x64xbf16> to vector<64x64xbf16>
    %cst_31 = arith.constant dense<0.000000e+00> : vector<1x64xf32>
    %44 = tpu.matmul %41, %43, %cst_31 {dimension_numbers = #tpu.dot_dimension_numbers<[1], [0], [0], [1], [0, 0, 1, 1], [], []>} : vector<1x64xbf16>, vector<64x64xbf16>, vector<1x64xf32> -> vector<1x64xf32>
    %45 = arith.truncf %34 : vector<8x64xf32> to vector<8x64xbf16>
    %c0_32 = arith.constant 0 : index
    %c0_33 = arith.constant 0 : index
    %c0_34 = arith.constant 0 : index
    %46 = vector.load %arg10[%c0_32, %c0_33, %c0_34] : memref<3x64x64xbf16, #tpu.memory_space<vmem>>, vector<1x64x64xbf16>
    %47 = vector.shape_cast %46 : vector<1x64x64xbf16> to vector<64x64xbf16>
    %cst_35 = arith.constant dense<0.000000e+00> : vector<8x64xf32>
    %48 = tpu.matmul %45, %47, %cst_35 {dimension_numbers = #tpu.dot_dimension_numbers<[1], [0], [0], [1], [0, 0, 1, 1], [], []>} : vector<8x64xbf16>, vector<64x64xbf16>, vector<8x64xf32> -> vector<8x64xf32>
    %49 = vector.broadcast %44 : vector<1x64xf32> to vector<8x64xf32>
    %50 = arith.addf %48, %49 : vector<8x64xf32>
    %c3 = arith.constant 3 : index
    %c0_36 = arith.constant 0 : index
    %51 = vector.load %arg14[%c3, %c0_36] : memref<8x64xf32, #tpu.memory_space<vmem>>, vector<1x64xf32>
    %52 = vector.broadcast %51 : vector<1x64xf32> to vector<8x64xf32>
    %53 = arith.addf %50, %52 : vector<8x64xf32>
    %cst_37 = arith.constant 0.000000e+00 : f32
    %54 = vector.broadcast %cst_37 : f32 to vector<8x64xf32>
    %55 = arith.subf %54, %53 : vector<8x64xf32>
    %56 = math.exp %55 : vector<8x64xf32>
    %cst_38 = arith.constant 1.000000e+00 : f32
    %57 = vector.broadcast %cst_38 : f32 to vector<8x64xf32>
    %58 = arith.addf %57, %56 : vector<8x64xf32>
    %cst_39 = arith.constant 1.000000e+00 : f32
    %59 = vector.broadcast %cst_39 : f32 to vector<8x64xf32>
    %60 = arith.divf %59, %58 : vector<8x64xf32>
    %61 = arith.mulf %53, %60 : vector<8x64xf32>
    %62 = arith.truncf %61 : vector<8x64xf32> to vector<8x64xbf16>
    %c2_40 = arith.constant 2 : index
    %c0_41 = arith.constant 0 : index
    %c0_42 = arith.constant 0 : index
    %63 = vector.load %arg10[%c2_40, %c0_41, %c0_42] : memref<3x64x64xbf16, #tpu.memory_space<vmem>>, vector<1x64x64xbf16>
    %64 = vector.shape_cast %63 : vector<1x64x64xbf16> to vector<64x64xbf16>
    %cst_43 = arith.constant dense<0.000000e+00> : vector<8x64xf32>
    %65 = tpu.matmul %62, %64, %cst_43 {dimension_numbers = #tpu.dot_dimension_numbers<[1], [0], [0], [1], [0, 0, 1, 1], [], []>} : vector<8x64xbf16>, vector<64x64xbf16>, vector<8x64xf32> -> vector<8x64xf32>
    %c4 = arith.constant 4 : index
    %c0_44 = arith.constant 0 : index
    %66 = vector.load %arg14[%c4, %c0_44] : memref<8x64xf32, #tpu.memory_space<vmem>>, vector<1x64xf32>
    %67 = vector.broadcast %66 : vector<1x64xf32> to vector<8x64xf32>
    %68 = arith.addf %65, %67 : vector<8x64xf32>
    %cst_45 = arith.constant 0.000000e+00 : f32
    %69 = vector.broadcast %cst_45 : f32 to vector<32x64xf32>
    %c0_46 = arith.constant 0 : index
    %c0_47 = arith.constant 0 : index
    %70 = vector.load %arg16[%c0_46, %c0_47] : memref<32x64xf32, #tpu.memory_space<vmem>>, vector<32x64xf32>
    tpu.vector_store %arg16[%c0_46, %c0_47], %69 {strides = array<i32>} : memref<32x64xf32, #tpu.memory_space<vmem>>, vector<32x64xf32>,
    %c0_48 = arith.constant 0 : index
    %c0_49 = arith.constant 0 : index
    %c0_50 = arith.constant 0 : index
    %71 = vector.load %arg2[%c0_48, %c0_49, %c0_50] : memref<1x8x64xf32, #tpu.memory_space<vmem>>, vector<1x8x64xf32>
    %72 = vector.shape_cast %71 : vector<1x8x64xf32> to vector<8x64xf32>
    %c0_51 = arith.constant 0 : index
    %c0_52 = arith.constant 0 : index
    %73 = vector.load %arg16[%c0_51, %c0_52] : memref<32x64xf32, #tpu.memory_space<vmem>>, vector<8x64xf32>
    tpu.vector_store %arg16[%c0_51, %c0_52], %72 {strides = array<i32>} : memref<32x64xf32, #tpu.memory_space<vmem>>, vector<8x64xf32>,
    %c8 = arith.constant 8 : index
    %c0_53 = arith.constant 0 : index
    %74 = vector.load %arg16[%c8, %c0_53] : memref<32x64xf32, #tpu.memory_space<vmem>>, vector<4x64xf32>
    tpu.vector_store %arg16[%c8, %c0_53], %21 {strides = array<i32>} : memref<32x64xf32, #tpu.memory_space<vmem>>, vector<4x64xf32>,
    %c16 = arith.constant 16 : index
    %c0_54 = arith.constant 0 : index
    %75 = vector.load %arg16[%c16, %c0_54] : memref<32x64xf32, #tpu.memory_space<vmem>>, vector<8x64xf32>
    tpu.vector_store %arg16[%c16, %c0_54], %68 {strides = array<i32>} : memref<32x64xf32, #tpu.memory_space<vmem>>, vector<8x64xf32>,
    %c24 = arith.constant 24 : index
    %c0_55 = arith.constant 0 : index
    %76 = vector.load %arg16[%c24, %c0_55] : memref<32x64xf32, #tpu.memory_space<vmem>>, vector<1x64xf32>
    tpu.vector_store %arg16[%c24, %c0_55], %28 {strides = array<i32>} : memref<32x64xf32, #tpu.memory_space<vmem>>, vector<1x64xf32>,
    %c0_56 = arith.constant 0 : index
    %c0_57 = arith.constant 0 : index
    %77 = vector.load %arg16[%c0_56, %c0_57] : memref<32x64xf32, #tpu.memory_space<vmem>>, vector<16x64xf32>
    %c16_58 = arith.constant 16 : index
    %c0_59 = arith.constant 0 : index
    %78 = vector.load %arg16[%c16_58, %c0_59] : memref<32x64xf32, #tpu.memory_space<vmem>>, vector<16x64xf32>
    %79 = arith.truncf %77 : vector<16x64xf32> to vector<16x64xbf16>
    %80 = arith.truncf %78 : vector<16x64xf32> to vector<16x64xbf16>
    %81 = tpu.iota {dimensions = array<i32: 1>} : vector<16x32xi32>
    %82 = tpu.iota {dimensions = array<i32: 0>} : vector<16x32xi32>
    %c16_i32 = arith.constant 16 : i32
    %83 = vector.broadcast %c16_i32 : i32 to vector<16x32xi32>
    %84 = arith.cmpi slt, %81, %83 : vector<16x32xi32>
    %c24_i32 = arith.constant 24 : i32
    %85 = vector.broadcast %c24_i32 : i32 to vector<16x32xi32>
    %86 = arith.cmpi eq, %81, %85 : vector<16x32xi32>
    %c1_i32 = arith.constant 1 : i32
    %c2_i32 = arith.constant 2 : i32
    %87 = vector.broadcast %c1_i32 : i32 to vector<16x32xi32>
    %88 = vector.broadcast %c2_i32 : i32 to vector<16x32xi32>
    %89 = arith.select %86, %87, %88 : vector<16x32xi1>, vector<16x32xi32>
    %c0_i32 = arith.constant 0 : i32
    %90 = vector.broadcast %c0_i32 : i32 to vector<16x32xi32>
    %91 = arith.select %84, %90, %89 : vector<16x32xi1>, vector<16x32xi32>
    %c8_i32 = arith.constant 8 : i32
    %92 = vector.broadcast %c8_i32 : i32 to vector<16x32xi32>
    %93 = arith.cmpi eq, %82, %92 : vector<16x32xi32>
    %c1_i32_60 = arith.constant 1 : i32
    %c2_i32_61 = arith.constant 2 : i32
    %94 = vector.broadcast %c1_i32_60 : i32 to vector<16x32xi32>
    %95 = vector.broadcast %c2_i32_61 : i32 to vector<16x32xi32>
    %96 = arith.select %93, %94, %95 : vector<16x32xi1>, vector<16x32xi32>
    %97 = arith.cmpi sle, %91, %96 : vector<16x32xi32>
    %c0_62 = arith.constant 0 : index
    %c0_63 = arith.constant 0 : index
    %c0_64 = arith.constant 0 : index
    %98 = vector.load %arg3[%c0_62, %c0_63, %c0_64] : memref<1x1x32xf32, #tpu.memory_space<vmem>>, vector<1x1x32xf32>
    %99 = vector.shape_cast %98 : vector<1x1x32xf32> to vector<1x32xf32>
    %cst_65 = arith.constant 5.000000e-01 : f32
    %100 = vector.broadcast %cst_65 : f32 to vector<1x32xf32>
    %101 = arith.cmpf ogt, %99, %100 : vector<1x32xf32>
    %102 = vector.broadcast %101 : vector<1x32xi1> to vector<16x32xi1>
    %103 = arith.andi %97, %102 : vector<16x32xi1>
    %cst_66 = arith.constant 0.000000e+00 : f32
    %104 = vector.broadcast %cst_66 : f32 to vector<16x64xf32>
    %c0_67 = arith.constant 0 : index
    %c0_68 = arith.constant 0 : index
    %c0_69 = arith.constant 0 : index
    %105 = vector.load %arg11[%c0_67, %c0_68, %c0_69] : memref<10x64x32xbf16, #tpu.memory_space<vmem>>, vector<1x64x32xbf16>
    %106 = vector.shape_cast %105 : vector<1x64x32xbf16> to vector<64x32xbf16>
    %cst_70 = arith.constant dense<0.000000e+00> : vector<16x32xf32>
    %107 = tpu.matmul %79, %106, %cst_70 {dimension_numbers = #tpu.dot_dimension_numbers<[1], [0], [0], [1], [0, 0, 1, 1], [], []>} : vector<16x64xbf16>, vector<64x32xbf16>, vector<16x32xf32> -> vector<16x32xf32>
    %c0_71 = arith.constant 0 : index
    %c0_72 = arith.constant 0 : index
    %c0_73 = arith.constant 0 : index
    %108 = vector.load %arg17[%c0_71, %c0_72, %c0_73] : memref<2x32x32xf32, #tpu.memory_space<vmem>>, vector<1x16x32xf32>
    %109 = vector.shape_cast %108 : vector<1x16x32xf32> to vector<16x32xf32>
    %110 = vector.shape_cast %107 : vector<16x32xf32> to vector<1x16x32xf32>
    tpu.vector_store %arg17[%c0_71, %c0_72, %c0_73], %110 {strides = array<i32>} : memref<2x32x32xf32, #tpu.memory_space<vmem>>, vector<1x16x32xf32>,
    %c1_74 = arith.constant 1 : index
    %c0_75 = arith.constant 0 : index
    %c0_76 = arith.constant 0 : index
    %111 = vector.load %arg11[%c1_74, %c0_75, %c0_76] : memref<10x64x32xbf16, #tpu.memory_space<vmem>>, vector<1x64x32xbf16>
    %112 = vector.shape_cast %111 : vector<1x64x32xbf16> to vector<64x32xbf16>
    %cst_77 = arith.constant dense<0.000000e+00> : vector<16x32xf32>
    %113 = tpu.matmul %79, %112, %cst_77 {dimension_numbers = #tpu.dot_dimension_numbers<[1], [0], [0], [1], [0, 0, 1, 1], [], []>} : vector<16x64xbf16>, vector<64x32xbf16>, vector<16x32xf32> -> vector<16x32xf32>
    %c0_78 = arith.constant 0 : index
    %c0_79 = arith.constant 0 : index
    %c0_80 = arith.constant 0 : index
    %114 = vector.load %arg18[%c0_78, %c0_79, %c0_80] : memref<2x32x32xf32, #tpu.memory_space<vmem>>, vector<1x16x32xf32>
    %115 = vector.shape_cast %114 : vector<1x16x32xf32> to vector<16x32xf32>
    %116 = vector.shape_cast %113 : vector<16x32xf32> to vector<1x16x32xf32>
    tpu.vector_store %arg18[%c0_78, %c0_79, %c0_80], %116 {strides = array<i32>} : memref<2x32x32xf32, #tpu.memory_space<vmem>>, vector<1x16x32xf32>,
    %c3_81 = arith.constant 3 : index
    %c0_82 = arith.constant 0 : index
    %c0_83 = arith.constant 0 : index
    %117 = vector.load %arg11[%c3_81, %c0_82, %c0_83] : memref<10x64x32xbf16, #tpu.memory_space<vmem>>, vector<1x64x32xbf16>
    %118 = vector.shape_cast %117 : vector<1x64x32xbf16> to vector<64x32xbf16>
    %cst_84 = arith.constant dense<0.000000e+00> : vector<16x32xf32>
    %119 = tpu.matmul %80, %118, %cst_84 {dimension_numbers = #tpu.dot_dimension_numbers<[1], [0], [0], [1], [0, 0, 1, 1], [], []>} : vector<16x64xbf16>, vector<64x32xbf16>, vector<16x32xf32> -> vector<16x32xf32>
    %c0_85 = arith.constant 0 : index
    %c16_86 = arith.constant 16 : index
    %c0_87 = arith.constant 0 : index
    %120 = vector.load %arg17[%c0_85, %c16_86, %c0_87] : memref<2x32x32xf32, #tpu.memory_space<vmem>>, vector<1x16x32xf32>
    %121 = vector.shape_cast %120 : vector<1x16x32xf32> to vector<16x32xf32>
    %122 = vector.shape_cast %119 : vector<16x32xf32> to vector<1x16x32xf32>
    tpu.vector_store %arg17[%c0_85, %c16_86, %c0_87], %122 {strides = array<i32>} : memref<2x32x32xf32, #tpu.memory_space<vmem>>, vector<1x16x32xf32>,
    %c4_88 = arith.constant 4 : index
    %c0_89 = arith.constant 0 : index
    %c0_90 = arith.constant 0 : index
    %123 = vector.load %arg11[%c4_88, %c0_89, %c0_90] : memref<10x64x32xbf16, #tpu.memory_space<vmem>>, vector<1x64x32xbf16>
    %124 = vector.shape_cast %123 : vector<1x64x32xbf16> to vector<64x32xbf16>
    %cst_91 = arith.constant dense<0.000000e+00> : vector<16x32xf32>
    %125 = tpu.matmul %80, %124, %cst_91 {dimension_numbers = #tpu.dot_dimension_numbers<[1], [0], [0], [1], [0, 0, 1, 1], [], []>} : vector<16x64xbf16>, vector<64x32xbf16>, vector<16x32xf32> -> vector<16x32xf32>
    %c0_92 = arith.constant 0 : index
    %c16_93 = arith.constant 16 : index
    %c0_94 = arith.constant 0 : index
    %126 = vector.load %arg18[%c0_92, %c16_93, %c0_94] : memref<2x32x32xf32, #tpu.memory_space<vmem>>, vector<1x16x32xf32>
    %127 = vector.shape_cast %126 : vector<1x16x32xf32> to vector<16x32xf32>
    %128 = vector.shape_cast %125 : vector<16x32xf32> to vector<1x16x32xf32>
    tpu.vector_store %arg18[%c0_92, %c16_93, %c0_94], %128 {strides = array<i32>} : memref<2x32x32xf32, #tpu.memory_space<vmem>>, vector<1x16x32xf32>,
    %c2_95 = arith.constant 2 : index
    %c0_96 = arith.constant 0 : index
    %c0_97 = arith.constant 0 : index
    %129 = vector.load %arg11[%c2_95, %c0_96, %c0_97] : memref<10x64x32xbf16, #tpu.memory_space<vmem>>, vector<1x64x32xbf16>
    %130 = vector.shape_cast %129 : vector<1x64x32xbf16> to vector<64x32xbf16>
    %cst_98 = arith.constant dense<0.000000e+00> : vector<16x32xf32>
    %131 = tpu.matmul %80, %130, %cst_98 {dimension_numbers = #tpu.dot_dimension_numbers<[1], [0], [0], [1], [0, 0, 1, 1], [], []>} : vector<16x64xbf16>, vector<64x32xbf16>, vector<16x32xf32> -> vector<16x32xf32>
    %c0_99 = arith.constant 0 : index
    %c0_100 = arith.constant 0 : index
    %c0_101 = arith.constant 0 : index
    %132 = vector.load %arg17[%c0_99, %c0_100, %c0_101] : memref<2x32x32xf32, #tpu.memory_space<vmem>>, vector<1x32x32xf32>
    %133 = vector.shape_cast %132 : vector<1x32x32xf32> to vector<32x32xf32>
    %cst_102 = arith.constant dense<0.000000e+00> : vector<16x32xf32>
    %134 = tpu.matmul %131, %133, %cst_102 {dimension_numbers = #tpu.dot_dimension_numbers<[1], [1], [0], [0], [0, 0, 1, 0], [], []>} : vector<16x32xf32>, vector<32x32xf32>, vector<16x32xf32> -> vector<16x32xf32>
    %cst_103 = arith.constant 0.176776692 : f32
    %135 = vector.broadcast %cst_103 : f32 to vector<16x32xf32>
    %136 = arith.mulf %134, %135 : vector<16x32xf32>
    %cst_104 = arith.constant -2.38197633E+38 : f32
    %137 = vector.broadcast %cst_104 : f32 to vector<16x32xf32>
    %138 = arith.select %103, %136, %137 : vector<16x32xi1>, vector<16x32xf32>
    %cst_105 = arith.constant dense<0xFF800000> : vector<16xf32>
    %139 = vector.multi_reduction <maximumf>, %138, %cst_105 [1] : vector<16x32xf32> to vector<16xf32>
    %140 = vector.shape_cast %139 : vector<16xf32> to vector<16x1xf32>
    %141 = vector.broadcast %140 : vector<16x1xf32> to vector<16x32xf32>
    %142 = arith.subf %138, %141 : vector<16x32xf32>
    %143 = math.exp %142 : vector<16x32xf32>
    %cst_106 = arith.constant dense<0.000000e+00> : vector<16xf32>
    %144 = vector.multi_reduction <add>, %143, %cst_106 [1] : vector<16x32xf32> to vector<16xf32>
    %145 = vector.shape_cast %144 : vector<16xf32> to vector<16x1xf32>
    %146 = vector.broadcast %145 : vector<16x1xf32> to vector<16x32xf32>
    %147 = arith.divf %143, %146 : vector<16x32xf32>
    %c0_107 = arith.constant 0 : index
    %c0_108 = arith.constant 0 : index
    %c0_109 = arith.constant 0 : index
    %148 = vector.load %arg18[%c0_107, %c0_108, %c0_109] : memref<2x32x32xf32, #tpu.memory_space<vmem>>, vector<1x32x32xf32>
    %149 = vector.shape_cast %148 : vector<1x32x32xf32> to vector<32x32xf32>
    %cst_110 = arith.constant dense<0.000000e+00> : vector<16x32xf32>
    %150 = tpu.matmul %147, %149, %cst_110 {dimension_numbers = #tpu.dot_dimension_numbers<[1], [0], [0], [1], [0, 0, 1, 1], [], []>} : vector<16x32xf32>, vector<32x32xf32>, vector<16x32xf32> -> vector<16x32xf32>
    %151 = arith.truncf %150 : vector<16x32xf32> to vector<16x32xbf16>
    %c0_111 = arith.constant 0 : index
    %c0_112 = arith.constant 0 : index
    %c0_113 = arith.constant 0 : index
    %152 = vector.load %arg12[%c0_111, %c0_112, %c0_113] : memref<2x32x64xbf16, #tpu.memory_space<vmem>>, vector<1x32x64xbf16>
    %153 = vector.shape_cast %152 : vector<1x32x64xbf16> to vector<32x64xbf16>
    %cst_114 = arith.constant dense<0.000000e+00> : vector<16x64xf32>
    %154 = tpu.matmul %151, %153, %cst_114 {dimension_numbers = #tpu.dot_dimension_numbers<[1], [0], [0], [1], [0, 0, 1, 1], [], []>} : vector<16x32xbf16>, vector<32x64xbf16>, vector<16x64xf32> -> vector<16x64xf32>
    %155 = arith.addf %104, %154 : vector<16x64xf32>
    %c5_115 = arith.constant 5 : index
    %c0_116 = arith.constant 0 : index
    %c0_117 = arith.constant 0 : index
    %156 = vector.load %arg11[%c5_115, %c0_116, %c0_117] : memref<10x64x32xbf16, #tpu.memory_space<vmem>>, vector<1x64x32xbf16>
    %157 = vector.shape_cast %156 : vector<1x64x32xbf16> to vector<64x32xbf16>
    %cst_118 = arith.constant dense<0.000000e+00> : vector<16x32xf32>
    %158 = tpu.matmul %79, %157, %cst_118 {dimension_numbers = #tpu.dot_dimension_numbers<[1], [0], [0], [1], [0, 0, 1, 1], [], []>} : vector<16x64xbf16>, vector<64x32xbf16>, vector<16x32xf32> -> vector<16x32xf32>
    %c1_119 = arith.constant 1 : index
    %c0_120 = arith.constant 0 : index
    %c0_121 = arith.constant 0 : index
    %159 = vector.load %arg17[%c1_119, %c0_120, %c0_121] : memref<2x32x32xf32, #tpu.memory_space<vmem>>, vector<1x16x32xf32>
    %160 = vector.shape_cast %159 : vector<1x16x32xf32> to vector<16x32xf32>
    %161 = vector.shape_cast %158 : vector<16x32xf32> to vector<1x16x32xf32>
    tpu.vector_store %arg17[%c1_119, %c0_120, %c0_121], %161 {strides = array<i32>} : memref<2x32x32xf32, #tpu.memory_space<vmem>>, vector<1x16x32xf32>,
    %c6_122 = arith.constant 6 : index
    %c0_123 = arith.constant 0 : index
    %c0_124 = arith.constant 0 : index
    %162 = vector.load %arg11[%c6_122, %c0_123, %c0_124] : memref<10x64x32xbf16, #tpu.memory_space<vmem>>, vector<1x64x32xbf16>
    %163 = vector.shape_cast %162 : vector<1x64x32xbf16> to vector<64x32xbf16>
    %cst_125 = arith.constant dense<0.000000e+00> : vector<16x32xf32>
    %164 = tpu.matmul %79, %163, %cst_125 {dimension_numbers = #tpu.dot_dimension_numbers<[1], [0], [0], [1], [0, 0, 1, 1], [], []>} : vector<16x64xbf16>, vector<64x32xbf16>, vector<16x32xf32> -> vector<16x32xf32>
    %c1_126 = arith.constant 1 : index
    %c0_127 = arith.constant 0 : index
    %c0_128 = arith.constant 0 : index
    %165 = vector.load %arg18[%c1_126, %c0_127, %c0_128] : memref<2x32x32xf32, #tpu.memory_space<vmem>>, vector<1x16x32xf32>
    %166 = vector.shape_cast %165 : vector<1x16x32xf32> to vector<16x32xf32>
    %167 = vector.shape_cast %164 : vector<16x32xf32> to vector<1x16x32xf32>
    tpu.vector_store %arg18[%c1_126, %c0_127, %c0_128], %167 {strides = array<i32>} : memref<2x32x32xf32, #tpu.memory_space<vmem>>, vector<1x16x32xf32>,
    %c8_129 = arith.constant 8 : index
    %c0_130 = arith.constant 0 : index
    %c0_131 = arith.constant 0 : index
    %168 = vector.load %arg11[%c8_129, %c0_130, %c0_131] : memref<10x64x32xbf16, #tpu.memory_space<vmem>>, vector<1x64x32xbf16>
    %169 = vector.shape_cast %168 : vector<1x64x32xbf16> to vector<64x32xbf16>
    %cst_132 = arith.constant dense<0.000000e+00> : vector<16x32xf32>
    %170 = tpu.matmul %80, %169, %cst_132 {dimension_numbers = #tpu.dot_dimension_numbers<[1], [0], [0], [1], [0, 0, 1, 1], [], []>} : vector<16x64xbf16>, vector<64x32xbf16>, vector<16x32xf32> -> vector<16x32xf32>
    %c1_133 = arith.constant 1 : index
    %c16_134 = arith.constant 16 : index
    %c0_135 = arith.constant 0 : index
    %171 = vector.load %arg17[%c1_133, %c16_134, %c0_135] : memref<2x32x32xf32, #tpu.memory_space<vmem>>, vector<1x16x32xf32>
    %172 = vector.shape_cast %171 : vector<1x16x32xf32> to vector<16x32xf32>
    %173 = vector.shape_cast %170 : vector<16x32xf32> to vector<1x16x32xf32>
    tpu.vector_store %arg17[%c1_133, %c16_134, %c0_135], %173 {strides = array<i32>} : memref<2x32x32xf32, #tpu.memory_space<vmem>>, vector<1x16x32xf32>,
    %c9 = arith.constant 9 : index
    %c0_136 = arith.constant 0 : index
    %c0_137 = arith.constant 0 : index
    %174 = vector.load %arg11[%c9, %c0_136, %c0_137] : memref<10x64x32xbf16, #tpu.memory_space<vmem>>, vector<1x64x32xbf16>
    %175 = vector.shape_cast %174 : vector<1x64x32xbf16> to vector<64x32xbf16>
    %cst_138 = arith.constant dense<0.000000e+00> : vector<16x32xf32>
    %176 = tpu.matmul %80, %175, %cst_138 {dimension_numbers = #tpu.dot_dimension_numbers<[1], [0], [0], [1], [0, 0, 1, 1], [], []>} : vector<16x64xbf16>, vector<64x32xbf16>, vector<16x32xf32> -> vector<16x32xf32>
    %c1_139 = arith.constant 1 : index
    %c16_140 = arith.constant 16 : index
    %c0_141 = arith.constant 0 : index
    %177 = vector.load %arg18[%c1_139, %c16_140, %c0_141] : memref<2x32x32xf32, #tpu.memory_space<vmem>>, vector<1x16x32xf32>
    %178 = vector.shape_cast %177 : vector<1x16x32xf32> to vector<16x32xf32>
    %179 = vector.shape_cast %176 : vector<16x32xf32> to vector<1x16x32xf32>
    tpu.vector_store %arg18[%c1_139, %c16_140, %c0_141], %179 {strides = array<i32>} : memref<2x32x32xf32, #tpu.memory_space<vmem>>, vector<1x16x32xf32>,
    %c7 = arith.constant 7 : index
    %c0_142 = arith.constant 0 : index
    %c0_143 = arith.constant 0 : index
    %180 = vector.load %arg11[%c7, %c0_142, %c0_143] : memref<10x64x32xbf16, #tpu.memory_space<vmem>>, vector<1x64x32xbf16>
    %181 = vector.shape_cast %180 : vector<1x64x32xbf16> to vector<64x32xbf16>
    %cst_144 = arith.constant dense<0.000000e+00> : vector<16x32xf32>
    %182 = tpu.matmul %80, %181, %cst_144 {dimension_numbers = #tpu.dot_dimension_numbers<[1], [0], [0], [1], [0, 0, 1, 1], [], []>} : vector<16x64xbf16>, vector<64x32xbf16>, vector<16x32xf32> -> vector<16x32xf32>
    %c1_145 = arith.constant 1 : index
    %c0_146 = arith.constant 0 : index
    %c0_147 = arith.constant 0 : index
    %183 = vector.load %arg17[%c1_145, %c0_146, %c0_147] : memref<2x32x32xf32, #tpu.memory_space<vmem>>, vector<1x32x32xf32>
    %184 = vector.shape_cast %183 : vector<1x32x32xf32> to vector<32x32xf32>
    %cst_148 = arith.constant dense<0.000000e+00> : vector<16x32xf32>
    %185 = tpu.matmul %182, %184, %cst_148 {dimension_numbers = #tpu.dot_dimension_numbers<[1], [1], [0], [0], [0, 0, 1, 0], [], []>} : vector<16x32xf32>, vector<32x32xf32>, vector<16x32xf32> -> vector<16x32xf32>
    %cst_149 = arith.constant 0.176776692 : f32
    %186 = vector.broadcast %cst_149 : f32 to vector<16x32xf32>
    %187 = arith.mulf %185, %186 : vector<16x32xf32>
    %cst_150 = arith.constant -2.38197633E+38 : f32
    %188 = vector.broadcast %cst_150 : f32 to vector<16x32xf32>
    %189 = arith.select %103, %187, %188 : vector<16x32xi1>, vector<16x32xf32>
    %cst_151 = arith.constant dense<0xFF800000> : vector<16xf32>
    %190 = vector.multi_reduction <maximumf>, %189, %cst_151 [1] : vector<16x32xf32> to vector<16xf32>
    %191 = vector.shape_cast %190 : vector<16xf32> to vector<16x1xf32>
    %192 = vector.broadcast %191 : vector<16x1xf32> to vector<16x32xf32>
    %193 = arith.subf %189, %192 : vector<16x32xf32>
    %194 = math.exp %193 : vector<16x32xf32>
    %cst_152 = arith.constant dense<0.000000e+00> : vector<16xf32>
    %195 = vector.multi_reduction <add>, %194, %cst_152 [1] : vector<16x32xf32> to vector<16xf32>
    %196 = vector.shape_cast %195 : vector<16xf32> to vector<16x1xf32>
    %197 = vector.broadcast %196 : vector<16x1xf32> to vector<16x32xf32>
    %198 = arith.divf %194, %197 : vector<16x32xf32>
    %c1_153 = arith.constant 1 : index
    %c0_154 = arith.constant 0 : index
    %c0_155 = arith.constant 0 : index
    %199 = vector.load %arg18[%c1_153, %c0_154, %c0_155] : memref<2x32x32xf32, #tpu.memory_space<vmem>>, vector<1x32x32xf32>
    %200 = vector.shape_cast %199 : vector<1x32x32xf32> to vector<32x32xf32>
    %cst_156 = arith.constant dense<0.000000e+00> : vector<16x32xf32>
    %201 = tpu.matmul %198, %200, %cst_156 {dimension_numbers = #tpu.dot_dimension_numbers<[1], [0], [0], [1], [0, 0, 1, 1], [], []>} : vector<16x32xf32>, vector<32x32xf32>, vector<16x32xf32> -> vector<16x32xf32>
    %202 = arith.truncf %201 : vector<16x32xf32> to vector<16x32xbf16>
    %c1_157 = arith.constant 1 : index
    %c0_158 = arith.constant 0 : index
    %c0_159 = arith.constant 0 : index
    %203 = vector.load %arg12[%c1_157, %c0_158, %c0_159] : memref<2x32x64xbf16, #tpu.memory_space<vmem>>, vector<1x32x64xbf16>
    %204 = vector.shape_cast %203 : vector<1x32x64xbf16> to vector<32x64xbf16>
    %cst_160 = arith.constant dense<0.000000e+00> : vector<16x64xf32>
    %205 = tpu.matmul %202, %204, %cst_160 {dimension_numbers = #tpu.dot_dimension_numbers<[1], [0], [0], [1], [0, 0, 1, 1], [], []>} : vector<16x32xbf16>, vector<32x64xbf16>, vector<16x64xf32> -> vector<16x64xf32>
    %206 = arith.addf %155, %205 : vector<16x64xf32>
    %207 = arith.addf %78, %206 : vector<16x64xf32>
    %208 = vector.extract_strided_slice %207 {offsets = [0, 0], sizes = [8, 64], strides = [1, 1]} : vector<16x64xf32> to vector<8x64xf32>
    %209 = arith.truncf %208 : vector<8x64xf32> to vector<8x64xbf16>
    %c0_161 = arith.constant 0 : index
    %c0_162 = arith.constant 0 : index
    %210 = vector.load %arg13[%c0_161, %c0_162] : memref<64x32xbf16, #tpu.memory_space<vmem>>, vector<64x32xbf16>
    %cst_163 = arith.constant dense<0.000000e+00> : vector<8x32xf32>
    %211 = tpu.matmul %209, %210, %cst_163 {dimension_numbers = #tpu.dot_dimension_numbers<[1], [0], [0], [1], [0, 0, 1, 1], [], []>} : vector<8x64xbf16>, vector<64x32xbf16>, vector<8x32xf32> -> vector<8x32xf32>
    %c7_164 = arith.constant 7 : index
    %c0_165 = arith.constant 0 : index
    %212 = vector.load %arg14[%c7_164, %c0_165] : memref<8x64xf32, #tpu.memory_space<vmem>>, vector<1x32xf32>
    %213 = vector.broadcast %212 : vector<1x32xf32> to vector<8x32xf32>
    %214 = arith.addf %211, %213 : vector<8x32xf32>
    %215 = arith.subf %13, %214 : vector<8x32xf32>
    %216 = arith.mulf %215, %215 : vector<8x32xf32>
    %c0_166 = arith.constant 0 : index
    %c0_167 = arith.constant 0 : index
    %c0_168 = arith.constant 0 : index
    %217 = vector.load %arg15[%c0_166, %c0_167, %c0_168] : memref<1x8x32xf32, #tpu.memory_space<vmem>>, vector<1x8x32xf32>
    %218 = vector.shape_cast %217 : vector<1x8x32xf32> to vector<8x32xf32>
    %219 = vector.shape_cast %216 : vector<8x32xf32> to vector<1x8x32xf32>
    tpu.vector_store %arg15[%c0_166, %c0_167, %c0_168], %219 {strides = array<i32>} : memref<1x8x32xf32, #tpu.memory_space<vmem>>, vector<1x8x32xf32>,
    return
  }
  func.func @transform_0(%arg0: i32) -> (i32, i32, i32) {
    %c0_i32 = arith.constant 0 : i32
    %c0_i32_0 = arith.constant 0 : i32
    %c0_i32_1 = arith.constant 0 : i32
    return %arg0, %c0_i32, %c0_i32_0 : i32, i32, i32
  }
  func.func @transform_1(%arg0: i32) -> (i32, i32, i32) {
    %c0_i32 = arith.constant 0 : i32
    %c0_i32_0 = arith.constant 0 : i32
    %c0_i32_1 = arith.constant 0 : i32
    return %arg0, %c0_i32, %c0_i32_0 : i32, i32, i32
  }
  func.func @transform_2(%arg0: i32) -> (i32, i32, i32) {
    %c0_i32 = arith.constant 0 : i32
    %c0_i32_0 = arith.constant 0 : i32
    %c0_i32_1 = arith.constant 0 : i32
    return %arg0, %c0_i32, %c0_i32_0 : i32, i32, i32
  }
  func.func @transform_3(%arg0: i32) -> (i32, i32, i32) {
    %c0_i32 = arith.constant 0 : i32
    %c0_i32_0 = arith.constant 0 : i32
    %c0_i32_1 = arith.constant 0 : i32
    return %arg0, %c0_i32, %c0_i32_0 : i32, i32, i32
  }
  func.func @transform_4(%arg0: i32) -> (i32, i32, i32) {
    %c0_i32 = arith.constant 0 : i32
    %c0_i32_0 = arith.constant 0 : i32
    %c0_i32_1 = arith.constant 0 : i32
    return %arg0, %c0_i32, %c0_i32_0 : i32, i32, i32
  }
  func.func @transform_5(%arg0: i32) -> (i32, i32, i32) {
    %c0_i32 = arith.constant 0 : i32
    %c0_i32_0 = arith.constant 0 : i32
    %c0_i32_1 = arith.constant 0 : i32
    return %arg0, %c0_i32, %c0_i32_0 : i32, i32, i32
  }
  func.func @transform_6(%arg0: i32) -> (i32, i32, i32) {
    %c0_i32 = arith.constant 0 : i32
    %c0_i32_0 = arith.constant 0 : i32
    %c0_i32_1 = arith.constant 0 : i32
    return %arg0, %c0_i32, %c0_i32_0 : i32, i32, i32
  }
  func.func @transform_7(%arg0: i32) -> (i32, i32) {
    %c0_i32 = arith.constant 0 : i32
    %c0_i32_0 = arith.constant 0 : i32
    %c0_i32_1 = arith.constant 0 : i32
    return %c0_i32, %c0_i32_0 : i32, i32
  }
  func.func @transform_8(%arg0: i32) -> (i32, i32) {
    %c0_i32 = arith.constant 0 : i32
    %c0_i32_0 = arith.constant 0 : i32
    %c0_i32_1 = arith.constant 0 : i32
    return %c0_i32, %c0_i32_0 : i32, i32
  }
  func.func @transform_9(%arg0: i32) -> (i32, i32, i32) {
    %c0_i32 = arith.constant 0 : i32
    %c0_i32_0 = arith.constant 0 : i32
    %c0_i32_1 = arith.constant 0 : i32
    %c0_i32_2 = arith.constant 0 : i32
    return %c0_i32, %c0_i32_0, %c0_i32_1 : i32, i32, i32
  }
  func.func @transform_10(%arg0: i32) -> (i32, i32, i32) {
    %c0_i32 = arith.constant 0 : i32
    %c0_i32_0 = arith.constant 0 : i32
    %c0_i32_1 = arith.constant 0 : i32
    %c0_i32_2 = arith.constant 0 : i32
    return %c0_i32, %c0_i32_0, %c0_i32_1 : i32, i32, i32
  }
  func.func @transform_11(%arg0: i32) -> (i32, i32, i32) {
    %c0_i32 = arith.constant 0 : i32
    %c0_i32_0 = arith.constant 0 : i32
    %c0_i32_1 = arith.constant 0 : i32
    %c0_i32_2 = arith.constant 0 : i32
    return %c0_i32, %c0_i32_0, %c0_i32_1 : i32, i32, i32
  }
  func.func @transform_12(%arg0: i32) -> (i32, i32) {
    %c0_i32 = arith.constant 0 : i32
    %c0_i32_0 = arith.constant 0 : i32
    %c0_i32_1 = arith.constant 0 : i32
    return %c0_i32, %c0_i32_0 : i32, i32
  }
  func.func @transform_13(%arg0: i32) -> (i32, i32) {
    %c0_i32 = arith.constant 0 : i32
    %c0_i32_0 = arith.constant 0 : i32
    %c0_i32_1 = arith.constant 0 : i32
    return %c0_i32, %c0_i32_0 : i32, i32
  }
  func.func @transform_14(%arg0: i32) -> (i32, i32, i32) {
    %c0_i32 = arith.constant 0 : i32
    %c0_i32_0 = arith.constant 0 : i32
    %c0_i32_1 = arith.constant 0 : i32
    return %arg0, %c0_i32, %c0_i32_0 : i32, i32, i32
  }
}

</mosaic_0001>

<bundles_post_ra>
// kernel: _lambda_.1
= control target key start
LH: loop header
LB: loop body
LE: loop exit
PB: predicated region body
PF: predicated region fallthrough
CT: control target
= control target key end

     0   :  { %s3463_s0 = inlined_call_operand.vmem [shape: f32[2,4,192], index: 0, kind: input, shape index: {}]   ;;  %s3464_s1 = inlined_call_operand.vmem [shape: f32[2,8,64], index: 1, kind: input, shape index: {}]   ;;  %s3465_s2 = inlined_call_operand.vmem [shape: f32[2,1,32], index: 2, kind: input, shape index: {}]   ;;  %s3466_s3 = inlined_call_operand.vmem [shape: f32[2,1,32], index: 3, kind: input, shape index: {}]   ;;  %s3467_s4 = inlined_call_operand.vmem [shape: f32[2,8,32], index: 4, kind: input, shape index: {}]   ;;  %s3468_s5 = inlined_call_operand.vmem [shape: f32[2,8,32], index: 5, kind: input, shape index: {}]   ;;  %s3469_s6 = inlined_call_operand.vmem [shape: f32[2,1,1], index: 6, kind: input, shape index: {}]   ;;  %s3470_s7 = inlined_call_operand.vmem [shape: bf16[192,64], index: 7, kind: input, shape index: {}]   ;;  %s3471_s8 = inlined_call_operand.vmem [shape: bf16[64,64], index: 8, kind: input, shape index: {}]   ;;  %s3472_s9 = inlined_call_operand.vmem [shape: bf16[3,64,64], index: 9, kind: input, shape index: {}]   ;;  %s3473_s10 = inlined_call_operand.vmem [shape: bf16[10,64,32], index: 10, kind: input, shape index: {}]   ;;  %s3474_s11 = inlined_call_operand.vmem [shape: bf16[2,32,64], index: 11, kind: input, shape index: {}]   ;;  %s3475_s12 = inlined_call_operand.vmem [shape: bf16[64,32], index: 12, kind: input, shape index: {}]   ;;  %s3476_s13 = inlined_call_operand.vmem [shape: f32[8,64], index: 13, kind: input, shape index: {}]   ;;  %s3477_s14 = inlined_call_operand.hbm [shape: f32[2,8,32], index: 14, kind: output, shape index: {}]  }
   0x1   :  { %3484 = sst [smem:[#allocation14_spill]] %s3469_s6 }
   0x2   :  { %19 = vsyncpa [#allocation6], 0 }
   0x3   :  { %21 = vsyncpa [#allocation6 + $0x1], 0  ;;  %s2928_s29 = smov 0   ;;  %s2930_s30 = smov 0  }
   0x4   :  { %s2932_s15 = smov 0   ;;  %s2934_s16 = smov 0  }
   0x5 LB: > { %3485 = sst [smem:[#allocation8_spill]] %s2830_s29  ;;  %s2949_s17 = sadd.s32 4294967295, %s2842_s16   ;;  %s2842_s16 = sphi %s2934_s16, %s3503_s16   ;;  %s2838_s15 = sphi %s2932_s15, %s3505_s15   ;;  %s2834_s30 = sphi %s2930_s30, %s3507_s30   ;;  %s2830_s29 = sphi %s2928_s29, %s3506_s29  }
   0x6   : > { %3486 = sst [smem:[#allocation9_spill]] %s2838_s15  ;;  %s2179_s18 = sadd.s32 4294967294, %s2842_s16  }
   0x7   : > { %3487 = sst [smem:[#allocation10_spill]] %s2842_s16  ;;  %s2953_s19 = sadd.s32 1, %s2842_s16  }
   0x8   : > { %3488 = sst [smem:[#allocation11_spill]] %s2953_s19  ;;  %s363_s20 = sadd.s32 1, %s2838_s15 }
   0x9   : > { %s360_s21 = ssub.s32 %s2842_s16, %s2953_s19  ;;  %p373_p0 = scmp.ne.s32.totalorder %s2838_s15, %s2834_s30 }
   0xa   : > { %p361_p1 = scmp.eq.s32.totalorder %s360_s21, 0  ;;  %p374_p2 = scmp.eq.s32.totalorder %s2949_s17, 1 }
   0xb   : > { %p379_p3 = scmp.ne.s32.totalorder %s2834_s30, %s2830_s29  ;;  %p380_p4 = scmp.eq.s32.totalorder %s2179_s18, 1 }
   0xc   : > { %s2964_s22 = scalar_select %p361_p1, %s2838_s15, %s363_s20  }
   0xd   : > { %p2966_p5 = por %p374_p2, %p373_p0  ;;  %p2970_p6 = por %p380_p4, %p379_p3 }
   0xe   : > { %3489 = sst [smem:[#allocation12_spill]] %s2964_s22  ;;  %p2182_p7 = scmp.ge.s32.totalorder %s2842_s16, 1 }
   0xf   : > { %s3491_s24 = scalar_select %p2970_p6, 1, 0 }
  0x10   : > { %p466_p8 = scmp.lt.s32.totalorder %s2842_s16, 3 }
  0x11   : > { %3492 = sst [smem:[#allocation13_spill]] %s3491_s24 }
  0x12   : > { %p467_p9 = pnand %p2182_p7, %p466_p8 }
  0x13   : > { %p533_p10 = scmp.lt.s32.totalorder (!%p467_p9), %s2949_s17, 1  ;;  %s3493_s6 = sld [smem:[#allocation14_spill]] (!%p467_p9) }
  0x14   : > { %470 = sbr.rel (%p467_p9) target bundleno = 1754 (0x6da), region = 76 }
  0x19   : > { %v2844_v0 = vmov 0   ;;  %s2980_s25 = scalar_select %p533_p10, %s2949_s17, 1  ;;  %v2643_v5 = vld [vmem:[%s3471_s8 + $0x18] sm:$0xff]  ;;  %v2642_v6 = vld [vmem:[%s3471_s8 + $0x10] sm:$0xff]  ;;  %v788_v7 = vld [vmem:[%s3476_s13 + $0x5] sm:$0x1] }
  0x1a   : > { %2753 = vset.pattern.permute.xlu1 %v2844_v0  ;;  %2752 = vset.pattern.permute.xlu0 %v2844_v0  ;;  %v795_v11 = vld [vmem:[%s3476_s13 + $0x6] sm:$0x1]  ;;  %v2641_v18 = vld [vmem:[%s3471_s8 + $0x8] sm:$0xff]  ;;  %v2647_v22 = vld [vmem:[%s3472_s9 + $0x38] sm:$0xff]  ;;  %vm736_vm0 = vcmask 261120  }
  0x1b   : > { %s558_s28 = scalar_lea.vmem %s3493_s6, %s2980_s25  ;;  %781 = vmatpush.bf16.msra.mxu3 %v2643_v5  ;;  %s2993_s26 = sshll.u32 %s2980_s25, 3  ;;  %746 = vmatpush.bf16.msra.mxu2 %v2641_v18  ;;  %v2640_v20 = vld [vmem:[%s3471_s8] sm:$0xff]  ;;  %v2646_v31 = vld [vmem:[%s3472_s9 + $0x30] sm:$0xff]  ;;  %v2645_v36 = vld [vmem:[%s3472_s9 + $0x28] sm:$0xff]  ;;  %v2845_v41 = vmov 683565275  }
  0x1c   : > { %v560_v1 = vld [vmem:[%s558_s28] sm:$0x1]  ;;  %s555_s6 = scalar_lea.vmem %s3468_s5, %s2993_s26  ;;  %s551_s21 = scalar_lea.vmem %s3467_s4, %s2993_s26  ;;  %v2846_v43 = vmov 2475754826   ;;  %v2847_v45 = vmov 2131351028  }
  0x1d   : > { %v2754_v2 = vld [vmem:[%s558_s28] ss:$0 sm:$0xff]  ;;  %790 = vperm.xlu1 %2753, %v560_v1   ;;  %v570_v3 = vsub.f32 1.0, %v560_v1  ;;  %s537_s29 = scalar_lea.vmem %s3463_s0, %s2993_s26  ;;  %s547_s20 = scalar_lea.vmem %s3466_s3, %s2980_s25  ;;  %v2848_v47 = vmov 2102212464  }
  0x1e   : > { %566 = vperm.xlu0 %2752, %v2754_v2   ;;  %v3013_v13 = vld [vmem:[%s555_s6] sm:$0xff]  ;;  %v2849_v49 = vmov 920167782   ;;  %v2850_v56 = vmov 1326507024   ;;  %s541_s18 = scalar_lea.vmem %s3464_s1, %s2993_s26  ;;  %s2624_s28 = sshll.u32 %s2949_s17, 3 }
  0x1f   : > { %v572_v4 = vperm.slane %v570_v3, 0  ;;  %782 = vmatpush.bf16.msra.mxu3 %v2642_v6  ;;  %v3015_v14 = vld [vmem:[%s551_s21] sm:$0xff]  ;;  %747 = vmatpush.bf16.msra.mxu2 %v2640_v20  ;;  %s530_s21 = sand.u32 1, %s2834_s30   ;;  %s2052_s19 = scalar_lea.hbm %s3477_s14, %s2624_s28 }
  0x20   : > { %v580_v16 = vld [vmem:[%s537_s29] sm:$0xff]  ;;  %v579_v17 = vsub.f32 %v3013_v13, %v3015_v14  ;;  %s2183_s27 = sshll.u32 %s530_s21, 3  ;;  %s2056_s24 = sshll.u32 %s2052_s19, 4  ;;  %s2057_s24 = int_to_ptr.hbm [resolvable:$true] %s2056_s24 }
  0x21   : > { %582 = vst [vmem:[#allocation1] ss:$2 sm:$0xff] %v580_v16  ;;  %v717_v21 = vld [vmem:[%s547_s20] sm:$0x1]  ;;  %s532_s6 = scalar_lea.vmem [#allocation5], %s2183_s27  ;;  %s2042_s17 = scalar_lea.sflag [#allocation6], %s530_s21 }
  0x22   : > { %v718_v28 = vpack.c.bf16 %v717_v21, %v717_v21  ;;  %v2644_v51 = vld [vmem:[%s3472_s9 + $0x20] sm:$0xff]  ;;  %s2054_s26 = sshll.u32 %s532_s6, 4  ;;  %s2794_s16 = sshra.s32 %s2057_s24, 4  ;;  %s2055_s26 = int_to_ptr.vmem [resolvable:$true] %s2054_s26  ;;  %s2795_s16 = int_to_ptr.hbm [resolvable:$true] %s2794_s16 }
  0x23   : > { %993 = vmatpush.bf16.msrb.mxu2 %v2647_v22  ;;  %s2796_s22 = scalar_lea.hbm %s2795_s16, 8  ;;  %s2800_s28 = scalar_lea.hbm %s3477_s14, 16 }
  0x24   : > { %2246 = vmatmul.msk.bf16.vlgmr.msra.gmra.mxu2 %vm736_vm0, %v718_v28  ;;  %p2797_p11 = scmp.ne.s32.totalorder %s2795_s16, %s2796_s22  ;;  %p2801_p0 = scmp.lt.s32.totalorder %s2795_s16, %s3477_s14 }
  0x25   : > { %p2802_p1 = scmp.lt.s32.totalorder %s2800_s28, %s2796_s22 }
  0x26   : > { %574 = vperm.xlu0 %2752, %v572_v4   ;;  %p2798_p12 = pnand %p2797_p11, %p2966_p5 }
  0x27   : > { %994 = vmatpush.bf16.msrb.mxu2 %v2646_v31  ;;  %p2803_p2 = por %p2802_p1, %p2801_p0 }
  0x28   : > { %p2799_p13 = pneg %p2798_p12 }
  0x2a   : > { %p2804_p3 = pnand %p2803_p2, %p2799_p13 }
  0x2b   : > { %995 = vmatpush.bf16.msrb.mxu2 %v2645_v36 }
  0x2f   : > { %996 = vmatpush.bf16.msrb.mxu2 %v2644_v51 }
  0x8f   : > { %v791_v8 = vpop.permute.xlu1 %790 }
  0x90   : > { %v793_v9 = vperm.slane %v791_v8, 0  ;;  %v567_v10 = vpop.permute.xlu0 %566 }
  0x91   : > { %v569_v26 = vmul.f32 %v567_v10, %v3013_v13 }
  0x92   : > { %v794_v12 = vmul.f32 %v793_v9, %v788_v7 }
  0x94   : > { %v3021_v15 = vadd.f32 %v795_v11, %v794_v12 }
  0x96   : > { %v800_v19 = vand.u32 2139095040, %v3021_v15  ;;  %v797_v25 = vand.u32 2147483647, %v3021_v15  ;;  %vm799_vm13 = vcmp.lt.s32.totalorder %v3021_v15, 0 }
  0x98   : > { %v801_v23 = vshrl.u32 %v800_v19, 23  ;;  %v575_v24 = vpop.permute.xlu0 %574  ;;  %v804_v33 = vand.u32 8388607, %v797_v25  ;;  %vm3102_vm14 = vcmp.le.f32.partialorder %v797_v25, 0.7853982 }
  0x99   : > { %v577_v27 = vmul.f32 %v575_v24, %v3015_v14 }
  0x9a   : > { %v2256_v29 = vadd.s32 4294967169, %v801_v23  ;;  %v805_v38 = vor.u32 8388608, %v804_v33 }
  0x9b   : > { %v578_v30 = vadd.f32 %v577_v27, %v569_v26 }
  0x9c   : > { %v807_v32 = vadd.s32 1, %v2256_v29  ;;  %v3054_v58 = vshll.u32 %v805_v38, 8 }
  0x9d   : > { %v753_v34 = vpack.c.bf16 %v578_v30, %v578_v30 }
  0x9e   : > { %vm808_vm1 = vcmp.gt.s32.totalorder %v807_v32, 0  ;;  %v846_v7 = vand.u32 65535, %v3054_v58  ;;  %v847_v8 = vshrl.u32 %v3054_v58, 16 }
  0x9f   : > { %v809_v35 = vsel %vm808_vm1, %v807_v32, 0  ;;  %2255 = vmatmul.msk.bf16.vlgmr.msra.gmra.mxu3 %vm736_vm0, %v753_v34 }
  0xa0   : > { %v811_v37 = vand.u32 31, %v809_v35  ;;  %v3048_v39 = vshrl.u32 %v809_v35, 5 }
  0xa2   : > { %v812_v40 = vsub.s32 32, %v811_v37  ;;  %v814_v42 = vshll.u32 %v2845_v41, %v811_v37  ;;  %v817_v44 = vshll.u32 %v2846_v43, %v811_v37  ;;  %v820_v46 = vshll.u32 %v2847_v45, %v811_v37 }
  0xa3   : > { %v823_v48 = vshll.u32 %v2848_v47, %v811_v37  ;;  %v826_v50 = vshll.u32 %v2849_v49, %v811_v37  ;;  %vm829_vm2 = vcmp.lt.s32.totalorder %v3048_v39, 1  ;;  %vm832_vm3 = vcmp.lt.s32.totalorder %v3048_v39, 4 }
  0xa4   : > { %v815_v52 = vshrl.u32 %v2846_v43, %v812_v40  ;;  %v818_v53 = vshrl.u32 %v2847_v45, %v812_v40  ;;  %v821_v54 = vshrl.u32 %v2848_v47, %v812_v40  ;;  %v824_v55 = vshrl.u32 %v2849_v49, %v812_v40 }
  0xa5   : > { %v827_v57 = vshrl.u32 %v2850_v56, %v812_v40  ;;  %vm831_vm4 = vcmp.lt.s32.totalorder %v3048_v39, 3  ;;  %vm830_vm5 = vcmp.lt.s32.totalorder %v3048_v39, 2  ;;  %v813_v19 = vshrl.u32 %v2845_v41, %v812_v40 }
  0xa6   : > { %v816_v59 = vor.u32 %v815_v52, %v814_v42  ;;  %v819_v60 = vor.u32 %v818_v53, %v817_v44  ;;  %v822_v61 = vor.u32 %v821_v54, %v820_v46  ;;  %v825_v62 = vor.u32 %v824_v55, %v823_v48 }
  0xa7   : > { %v828_v63 = vor.u32 %v827_v57, %v826_v50 }
  0xa8   : > { %v837_v1 = vsel %vm829_vm2, %v816_v59, %v819_v60  ;;  %v841_v2 = vsel %vm829_vm2, %v819_v60, %v822_v61  ;;  %v838_v3 = vsel %vm832_vm3, %v825_v62, 920167782  ;;  %v833_v33 = vsel %vm829_vm2, %v813_v19, %v816_v59  ;;  %v2651_v19 = vld [vmem:[%s3472_s9 + $0x18] sm:$0xff] }
  0xa9   : > { %v842_v4 = vsel %vm832_vm3, %v828_v63, 1326507024  ;;  %v839_v5 = vsel %vm831_vm4, %v822_v61, %v838_v3  ;;  %v834_v35 = vsel %vm832_vm3, %v822_v61, 2102212464  ;;  %1043 = vmatpush.bf16.msrb.mxu3 %v2651_v19  ;;  %vm940_vm3 = vweird.f32 %v3021_v15  ;;  %v2628_v19 = vld [vmem:[%s3470_s7] sm:$0xff] }
  0xaa   : > { %v843_v6 = vsel %vm831_vm4, %v825_v62, %v842_v4  ;;  %v840_v9 = vsel %vm830_vm5, %v837_v1, %v839_v5  ;;  %v835_v45 = vsel %vm831_vm4, %v819_v60, %v834_v35  ;;  %vm687_vm4 = vcmask 523264  }
  0xab   : > { %v844_v10 = vsel %vm830_vm5, %v841_v2, %v843_v6  ;;  %v870_v16 = vand.u32 65535, %v840_v9  ;;  %v871_v18 = vshrl.u32 %v840_v9, 16  ;;  %v836_v53 = vsel %vm830_vm5, %v833_v33, %v835_v45 }
  0xac   : > { %v848_v11 = vand.u32 65535, %v844_v10  ;;  %v849_v12 = vshrl.u32 %v844_v10, 16  ;;  %v890_v57 = vmul.u32 %v3054_v58, %v836_v53  ;;  %vm1136_vm5 = vcmask 516096  }
  0xad   : > { %v872_v23 = vmul.u32 %v870_v16, %v846_v7  ;;  %v873_v24 = vmul.u32 %v871_v18, %v846_v7  ;;  %v874_v26 = vmul.u32 %v870_v16, %v847_v8  ;;  %v875_v30 = vmul.u32 %v871_v18, %v847_v8 }
  0xae   : > { %v850_v20 = vmul.u32 %v848_v11, %v846_v7  ;;  %v851_v21 = vmul.u32 %v849_v12, %v846_v7  ;;  %v852_v22 = vmul.u32 %v848_v11, %v847_v8  ;;  %v853_v27 = vmul.u32 %v849_v12, %v847_v8 }
  0xaf   : > { %v876_v31 = vshll.u32 %v873_v24, 16  ;;  %v878_v32 = vshll.u32 %v874_v26, 16  ;;  %v877_v43 = vshrl.u32 %v873_v24, 16  ;;  %v879_v49 = vshrl.u32 %v874_v26, 16  ;;  %v2649_v26 = vld [vmem:[%s3472_s9 + $0x8] sm:$0xff] }
  0xb0   : > { %v854_v28 = vshll.u32 %v851_v21, 16  ;;  %v856_v29 = vshll.u32 %v852_v22, 16  ;;  %v855_v40 = vshrl.u32 %v851_v21, 16  ;;  %v857_v46 = vshrl.u32 %v852_v22, 16  ;;  %v2650_v22 = vld [vmem:[%s3472_s9 + $0x10] sm:$0xff] }
  0xb1   : > { %vm880_vm7 = vc.u32 %v872_v23, %v876_v31  ;;  %v882_v37 = vadd.s32 %v876_v31, %v872_v23  ;;  %1044 = vmatpush.bf16.msrb.mxu3 %v2650_v22 }
  0xb2   : > { %vm858_vm6 = vc.u32 %v850_v20, %v854_v28  ;;  %v860_v34 = vadd.s32 %v854_v28, %v850_v20  ;;  %v881_v41 = vsel %vm880_vm7, 1, %v2844_v0 }
  0xb3   : > { %v859_v36 = vsel %vm858_vm6, 1, %v2844_v0  ;;  %v883_v44 = vadd.s32 %v881_v41, %v875_v30  ;;  %vm884_vm9 = vc.u32 %v882_v37, %v878_v32  ;;  %v886_v52 = vadd.s32 %v882_v37, %v878_v32 }
  0xb4   : > { %v861_v38 = vadd.s32 %v859_v36, %v853_v27  ;;  %vm862_vm8 = vc.u32 %v860_v34, %v856_v29  ;;  %v885_v48 = vsel %vm884_vm9, 1, %v2844_v0  ;;  %v2654_v27 = vld [vmem:[%s3472_s9 + $0x50] sm:$0xff] }
  0xb5   : > { %v863_v42 = vsel %vm862_vm8, 1, %v2844_v0  ;;  %v887_v50 = vadd.s32 %v885_v48, %v883_v44  ;;  %1045 = vmatpush.bf16.msrb.mxu3 %v2649_v26  ;;  %v2655_v26 = vld [vmem:[%s3472_s9 + $0x58] sm:$0xff] }
  0xb6   : > { %v865_v47 = vadd.s32 %v863_v42, %v861_v38 }
  0xb7   : > { %v888_v54 = vadd.s32 %v887_v50, %v877_v43 }
  0xb8   : > { %v866_v51 = vadd.s32 %v865_v47, %v855_v40 }
  0xb9   : > { %v889_v56 = vadd.s32 %v888_v54, %v879_v49 }
  0xba   : > { %v867_v55 = vadd.s32 %v866_v51, %v857_v46 }
  0xbb   : > { %v893_v59 = vadd.s32 1, %v889_v56 }
  0xbc   : > { %vm892_vm10 = vc.u32 %v867_v55, %v886_v52  ;;  %v891_v39 = vadd.s32 %v886_v52, %v867_v55 }
  0xbd   : > { %v894_v61 = vsel %vm892_vm10, %v893_v59, %v889_v56  ;;  %v2648_v56 = vld [vmem:[%s3472_s9] sm:$0xff]  ;;  %v2851_v59 = vmov 0.0   ;;  %vm1133_vm10 = vcmask 519168  }
  0xbe   : > { %v895_v60 = vadd.s32 %v894_v61, %v890_v57  ;;  %1046 = vmatpush.bf16.msrb.mxu3 %v2648_v56  ;;  %v1131_v57 = vld [vmem:[%s541_s18] sm:$0xff]  ;;  %1127 = vst.msk [vmem:[#allocation2] sm:$0xff] %vm687_vm4, %v2851_v59  ;;  %v2657_v56 = vld [vmem:[%s3473_s10 + $0x8] sm:$0xff]  ;;  %s544_s18 = scalar_lea.vmem %s3465_s2, %s2980_s25 }
  0xbf   : > { %1130 = vst.msk [vmem:[#allocation2 + $0x18] sm:$0xff] %vm687_vm4, %v2851_v59  ;;  %v2755_v61 = vld [vmem:[%s3476_s13 + $0x2] ss:$0 sm:$0xff] }
  0xc0   : > { %v896_v62 = vadd.s32 536870912, %v895_v60  ;;  %1132 = vst.msk [vmem:[#allocation2] sm:$0xff] %vm687_vm4, %v1131_v57  ;;  %v2661_v57 = vld [vmem:[%s3473_s10 + $0x28] sm:$0xff] }
  0xc1   : > { %1128 = vst.msk [vmem:[#allocation2 + $0x8] sm:$0xff] %vm687_vm4, %v2851_v59 }
  0xc2   : > { %v897_v63 = vshrl.u32 %v896_v62, 30  ;;  %1129 = vst.msk [vmem:[#allocation2 + $0x10] sm:$0xff] %vm687_vm4, %v2851_v59  ;;  %v2656_v59 = vld [vmem:[%s3473_s10] sm:$0xff] }
  0xc4   : > { %v898_v1 = vshll.u32 %v897_v63, 30  ;;  %v921_v29 = vsub.s32 4, %v897_v63 }
  0xc6   : > { %v899_v2 = vsub.s32 %v895_v60, %v898_v1  ;;  %v922_v34 = vsel %vm799_vm13, %v921_v29, %v897_v63  ;;  %v749_v60 = vpop.f32.mrf.mxu2  ;;  %v2756_v29 = vld [vmem:[%s3476_s13 + $0x3] ss:$0 sm:$0xff] }
  0xc7   : > { %v924_v37 = vsel %vm3102_vm14, 0, %v922_v34  ;;  %v2652_v34 = vld [vmem:[%s3472_s9 + $0x40] sm:$0xff] }
  0xc8   : > { %vm900_vm11 = vcmp.lt.s32.totalorder %v899_v2, 0  ;;  %v901_v3 = vsub.s32 0, %v899_v2  ;;  %v941_v42 = vadd.s32 3, %v924_v37 }
  0xca   : > { %v902_v4 = vsel %vm900_vm11, %v901_v3, %v899_v2  ;;  %v942_v47 = vand.u32 3, %v941_v42 }
  0xcb   : > { %v903_v5 = vclz %v902_v4 }
  0xcc   : > { %vm944_vm15 = vcmp.eq.s32.totalorder %v942_v47, 0  ;;  %vm947_vm1 = vcmp.eq.s32.totalorder %v942_v47, 2  ;;  %vm943_vm2 = vcmp.lt.s32.totalorder %v942_v47, 2 }
  0xcd   : > { %v2257_v6 = vadd.s32 4294967294, %v903_v5  ;;  %v2635_v5 = vld [vmem:[%s3470_s7 + $0x38] sm:$0xff] }
  0xce   : > { %v751_v3 = vpop.f32.mrf.mxu2  ;;  %691 = vmatpush.bf16.msra.mxu0 %v2635_v5 }
  0xcf   : > { %vm2258_vm12 = vcmp.lt.s32.totalorder %v2257_v6, 0 }
  0xd0   : > { %v906_v7 = vsel %vm2258_vm12, 0, %v2257_v6  ;;  %v2639_v6 = vld [vmem:[%s3470_s7 + $0x58] sm:$0xff] }
  0xd1   : > { %v907_v8 = vsub.s32 32, %v906_v7  ;;  %v911_v9 = vsub.s32 4294967266, %v906_v7  ;;  %v908_v10 = vshll.u32 %v899_v2, %v906_v7  ;;  %708 = vmatpush.bf16.msra.mxu1 %v2639_v6  ;;  %v2633_v7 = vld [vmem:[%s3470_s7 + $0x28] sm:$0xff] }
  0xd3   : > { %v909_v58 = vshrl.u32 %v891_v39, %v907_v8  ;;  %v912_v11 = vadd.s32 127, %v911_v9  ;;  %v2634_v39 = vld [vmem:[%s3470_s7 + $0x30] sm:$0xff]  ;;  %v2632_v8 = vld [vmem:[%s3470_s7 + $0x20] sm:$0xff]  ;;  %v2631_v9 = vld [vmem:[%s3470_s7 + $0x18] sm:$0xff] }
  0xd4   : > { %692 = vmatpush.bf16.msra.mxu0 %v2634_v39  ;;  %v1138_v39 = vld [vmem:[#allocation2] sm:$0xff] }
  0xd5   : > { %v910_v12 = vor.u32 %v909_v58, %v908_v10  ;;  %v913_v16 = vshll.u32 %v912_v11, 23  ;;  %v2630_v11 = vld [vmem:[%s3470_s7 + $0x10] sm:$0xff] }
  0xd7   : > { %v914_v18 = vor.u32 4788187, %v913_v16  ;;  %v917_v21 = vcvt.s32.f32 %v910_v12  ;;  %v2638_v12 = vld [vmem:[%s3470_s7 + $0x50] sm:$0xff]  ;;  %v2629_v16 = vld [vmem:[%s3470_s7 + $0x8] sm:$0xff] }
  0xd8   : > { %693 = vmatpush.bf16.msra.mxu0 %v2633_v7  ;;  %709 = vmatpush.bf16.msra.mxu1 %v2638_v12  ;;  %v2669_v12 = vld [vmem:[%s3473_s10 + $0x88] sm:$0xff] }
  0xd9   : > { %v915_v20 = vand.u32 2147483647, %v914_v18  ;;  %v2637_v18 = vld [vmem:[%s3470_s7 + $0x48] sm:$0xff] }
  0xdb   : > { %v918_v23 = vmul.f32 %v917_v21, %v915_v20  ;;  %v2636_v20 = vld [vmem:[%s3470_s7 + $0x40] sm:$0xff] }
  0xdc   : > { %694 = vmatpush.bf16.msra.mxu0 %v2632_v8  ;;  %710 = vmatpush.bf16.msra.mxu1 %v2637_v18  ;;  %v583_v21 = vld.sshfl [vmem:[#allocation1] sm:$0xff pattern:$0x75316420] }
  0xdd   : > { %v919_v24 = vxor.u32 2147483648, %v918_v23  ;;  %v587_v22 = vpack.c.bf16 %v583_v21, %v583_v21  ;;  %v2664_v18 = vld [vmem:[%s3473_s10 + $0x60] sm:$0xff]  ;;  %v2681_v21 = vld [vmem:[%s3473_s10 + $0xb8] sm:$0xff] }
  0xdf   : > { %v920_v28 = vsel %vm799_vm13, %v919_v24, %v918_v23  ;;  %v584_v23 = vld.sshfl [vmem:[#allocation1 + $0x8] sm:$0xff pattern:$0x75316420] }
  0xe0   : > { %v923_v30 = vsel %vm3102_vm14, %v3021_v15, %v920_v28  ;;  %v723_v15 = vld [vmem:[%s3476_s13 + $0x1] sm:$0x1]  ;;  %695 = vmatpush.bf16.msra.mxu0 %v2631_v9  ;;  %711 = vmatpush.bf16.msra.mxu1 %v2636_v20  ;;  %v588_v24 = vpack.c.bf16 %v584_v23, %v584_v23  ;;  %v2666_v9 = vld [vmem:[%s3473_s10 + $0x70] sm:$0xff] }
  0xe1   : > { %v925_v31 = vmul.f32 %v923_v30, %v923_v30  ;;  %v750_v62 = vadd.f32 %v749_v60, %v723_v15  ;;  %v2660_v15 = vld [vmem:[%s3473_s10 + $0x20] sm:$0xff]  ;;  %v2671_v60 = vld [vmem:[%s3473_s10 + $0x98] sm:$0xff]  ;;  %v2680_v23 = vld [vmem:[%s3473_s10 + $0xb0] sm:$0xff] }
  0xe2   : > { %v2672_v20 = vld [vmem:[%s3473_s10 + $0x40] sm:$0xff] }
  0xe3   : > { %v926_v32 = vmul.f32 -0.001358992, %v925_v31  ;;  %v933_v33 = vmul.f32 -0.00019511016, %v925_v31  ;;  %1137 = vst.msk [vmem:[#allocation2 + $0x18] sm:$0x1] %vm1136_vm5, %v750_v62  ;;  %2237 = vmatmul.msk.bf16.vlgmr.msra.gmra.mxu1 %vm687_vm4, %v588_v24 }
  0xe4   : > { %696 = vmatpush.bf16.msra.mxu0 %v2630_v11  ;;  %1118 = vmatpush.bf16.msrb.mxu1 %v2655_v26  ;;  %v2675_v62 = vld [vmem:[%s3473_s10 + $0x58] sm:$0xff]  ;;  %v2665_v11 = vld [vmem:[%s3473_s10 + $0x68] sm:$0xff]  ;;  %v2684_v24 = vld [vmem:[%s3473_s10 + $0xd0] sm:$0xff] }
  0xe5   : > { %v927_v35 = vadd.f32 0.041655596, %v926_v32  ;;  %v934_v36 = vadd.f32 0.008332121, %v933_v33  ;;  %v2679_v26 = vld [vmem:[%s3473_s10 + $0xa8] sm:$0xff] }
  0xe7   : > { %v928_v25 = vmul.f32 %v927_v35, %v925_v31  ;;  %v935_v38 = vmul.f32 %v934_v36, %v925_v31 }
  0xe8   : > { %697 = vmatpush.bf16.msra.mxu0 %v2629_v16  ;;  %1119 = vmatpush.bf16.msrb.mxu1 %v2654_v27  ;;  %v2673_v16 = vld [vmem:[%s3473_s10 + $0x48] sm:$0xff] }
  0xe9   : > { %v929_v40 = vadd.f32 -0.4999988, %v928_v25  ;;  %v936_v41 = vadd.f32 -0.16666654, %v935_v38  ;;  %v2683_v27 = vld [vmem:[%s3473_s10 + $0xc8] sm:$0xff] }
  0xeb   : > { %v930_v43 = vmul.f32 %v929_v40, %v925_v31  ;;  %v937_v44 = vmul.f32 %v936_v41, %v925_v31  ;;  %v2653_v31 = vld [vmem:[%s3472_s9 + $0x48] sm:$0xff] }
  0xec   : > { %698 = vmatpush.bf16.msra.mxu0 %v2628_v19  ;;  %1120 = vmatpush.bf16.msrb.mxu1 %v2653_v31  ;;  %v2668_v19 = vld [vmem:[%s3473_s10 + $0x80] sm:$0xff] }
  0xed   : > { %v931_v45 = vadd.f32 1.0, %v930_v43  ;;  %v938_v46 = vadd.f32 1.0, %v937_v44 }
  0xef   : > { %v939_v48 = vmul.f32 %v938_v46, %v923_v30  ;;  %v948_v49 = vxor.u32 2147483648, %v931_v45  ;;  %699 = vmatmul.bf16.vlgmr.msra.gmra.mxu0 %v587_v22  ;;  %v2685_v22 = vld [vmem:[%s3473_s10 + $0xd8] sm:$0xff] }
  0xf0   : > { %1121 = vmatpush.bf16.msrb.mxu1 %v2652_v34 }
  0xf1   : > { %v945_v50 = vxor.u32 2147483648, %v939_v48  ;;  %v949_v52 = vsel %vm947_vm1, %v948_v49, %v939_v48 }
  0xf3   : > { %v946_v51 = vsel %vm944_vm15, %v931_v45, %v945_v50 }
  0xf4   : > { %v950_v53 = vsel %vm943_vm2, %v946_v51, %v949_v52  ;;  %v2659_v52 = vld [vmem:[%s3473_s10 + $0x18] sm:$0xff]  ;;  %1355 = vmatpush.bf16.msra.mxu1 %v2671_v60 }
  0xf5   : > { %v951_v54 = vsel %vm940_vm3, nan, %v950_v53  ;;  %v2663_v53 = vld [vmem:[%s3473_s10 + $0x38] sm:$0xff]  ;;  %1205 = vmatpush.bf16.msra.mxu2 %v2659_v52 }
  0xf6   : > { %v952_v55 = vpack.c.bf16 %v951_v54, %v951_v54  ;;  %1254 = vmatpush.bf16.msra.mxu3 %v2663_v53  ;;  %v2658_v54 = vld [vmem:[%s3473_s10 + $0x10] sm:$0xff]  ;;  %v2689_v60 = vld [vmem:[%s3473_s10 + $0x118] sm:$0xff] }
  0xf8   : > { %2283 = vmatmul.msk.bf16.vlgmr.msrb.gmra.mxu2 %vm687_vm4, %v952_v55  ;;  %v2662_v55 = vld [vmem:[%s3473_s10 + $0x30] sm:$0xff] }
  0xf9   : > { %1206 = vmatpush.bf16.msra.mxu2 %v2658_v54 }
  0xfa   : > { %1255 = vmatpush.bf16.msra.mxu3 %v2662_v55 }
  0xfd   : > { %1207 = vmatpush.bf16.msra.mxu2 %v2657_v56 }
  0xfe   : > { %1256 = vmatpush.bf16.msra.mxu3 %v2661_v57 }
 0x101   : > { %1208 = vmatpush.bf16.msra.mxu2 %v2656_v59 }
 0x102   : > { %1257 = vmatpush.bf16.msra.mxu3 %v2660_v15 }
 0x105   : > { %1404 = vmatpush.bf16.msrb.mxu2 %v2675_v62 }
 0x122   : > { %v784_v63 = vpop.f32.mrf.mxu3 }
 0x123   : > { %v785_v1 = vadd.f32 %v2755_v61, %v784_v63  ;;  %v2667_v61 = vld [vmem:[%s3473_s10 + $0x78] sm:$0xff]  ;;  %v2757_v63 = vld [vmem:[%s3476_s13] ss:$0 sm:$0xff] }
 0x124   : > { %1306 = vmatpush.bf16.msrb.mxu0 %v2667_v61 }
 0x125   : > { %v1002_v2 = vpack.c.bf16 %v785_v1, %v785_v1 }
 0x127   : > { %2300 = vmatmul.msk.bf16.vlgmr.msrb.gmra.mxu3 %vm687_vm4, %v1002_v2 }
 0x128   : > { %1307 = vmatpush.bf16.msrb.mxu0 %v2666_v9 }
 0x12a   : > { %v786_v4 = vpop.f32.mrf.mxu3 }
 0x12c   : > { %1308 = vmatpush.bf16.msrb.mxu0 %v2665_v11 }
 0x130   : > { %1309 = vmatpush.bf16.msrb.mxu0 %v2664_v18 }
 0x160   : > { %v713_v3 = vpop.f32.mrf.mxu1 }
 0x168   : > { %v715_v6 = vpop.f32.mrf.mxu1 }
 0x16c   : > { %v700_v1 = vpop.f32.mrf.mxu0 }
 0x16d   : > { %v701_v2 = vadd.f32 %v2757_v63, %v700_v1  ;;  %v2688_v63 = vld [vmem:[%s3473_s10 + $0x110] sm:$0xff] }
 0x16f   : > { %v714_v4 = vadd.f32 %v713_v3, %v701_v2  ;;  %v2687_v2 = vld [vmem:[%s3473_s10 + $0x108] sm:$0xff]  ;;  %v2686_v3 = vld [vmem:[%s3473_s10 + $0x100] sm:$0xff] }
 0x171   : > { %1134 = vst.msk [vmem:[#allocation2 + $0x8] sm:$0xf] %vm1133_vm10, %v714_v4  ;;  %v1159_v4 = vld [vmem:[%s544_s18] sm:$0x1] }
 0x172   : > { %vm1160_vm11 = vcmp.gt.f32.partialorder %v1159_v4, 0.5 }
 0x174   : > { %v702_v5 = vpop.f32.mrf.mxu0 }
 0x175   : > { %v1144_v5 = vlaneseq }
 0x177   : > { %v1147_v6 = vshrl.u32 %v1144_v5, 7 }
 0x178   : > { %v1139_v7 = vld [vmem:[#allocation2 + $0x8] sm:$0xff] }
 0x179   : > { %v1142_v8 = vpack.c.bf16 %v1139_v7, %v1138_v39  ;;  %v1145_v39 = vand.u32 127, %v1144_v5  ;;  %v1161_v7 = vsel %vm1160_vm11, 1, %v2844_v0 }
 0x17a   : > { %v1162_v9 = vperm.slane %v1161_v7, 0 }
 0x17b   : > { %v998_v10 = vpop.f32.mrf.mxu2  ;;  %2342 = vmatmul.msk.bf16.vlgmr.msra.gmra.mxu2 %vm687_vm4, %v1142_v8  ;;  %2367 = vmatmul.msk.bf16.vlgmr.msra.gmra.mxu3 %vm687_vm4, %v1142_v8  ;;  %vm1150_vm12 = vcmp.eq.s32.totalorder %v1145_v39, 24  ;;  %vm1149_vm13 = vcmp.lt.s32.totalorder %v1145_v39, 16 }
 0x17c   : > { %v1011_v28 = vperm.slane %v998_v10, 0  ;;  %v2670_v10 = vld [vmem:[%s3473_s10 + $0x90] sm:$0xff]  ;;  %vm3342_vm15 = vcmp.eq.s32.totalorder %v1162_v9, 1 }
 0x17d   : > { %1356 = vmatpush.bf16.msra.mxu1 %v2670_v10  ;;  %v2852_v10 = vmov 2  }
 0x181   : > { %1357 = vmatpush.bf16.msra.mxu1 %v2669_v12 }
 0x183   : > { %v1000_v58 = vpop.f32.mrf.mxu2 }
 0x184   : > { %v2674_v58 = vld [vmem:[%s3473_s10 + $0x50] sm:$0xff] }
 0x185   : > { %1405 = vmatpush.bf16.msrb.mxu2 %v2674_v58  ;;  %1358 = vmatpush.bf16.msra.mxu1 %v2668_v19  ;;  %v1151_v58 = vsel %vm1150_vm12, 1, %v2852_v10 }
 0x186   : > { %v1152_v18 = vsel %vm1149_vm13, 0, %v1151_v58 }
 0x189   : > { %1406 = vmatpush.bf16.msrb.mxu2 %v2673_v16 }
 0x18d   : > { %1407 = vmatpush.bf16.msrb.mxu2 %v2672_v20 }
 0x191   : > { %1636 = vmatpush.bf16.msra.mxu2 %v2685_v22 }
 0x195   : > { %1637 = vmatpush.bf16.msra.mxu2 %v2684_v24 }
 0x199   : > { %1638 = vmatpush.bf16.msra.mxu2 %v2683_v27 }
 0x1aa   : > { %v1048_v30 = vpop.f32.mrf.mxu3 }
 0x1ab   : > { %v1049_v32 = vadd.f32 %v1048_v30, %v1011_v28  ;;  %v2678_v28 = vld [vmem:[%s3473_s10 + $0xa0] sm:$0xff] }
 0x1ac   : > { %v2758_v30 = vld [vmem:[%s3476_s13 + $0x4] ss:$0 sm:$0xff] }
 0x1ad   : > { %v1054_v33 = vadd.f32 %v2756_v29, %v1049_v32  ;;  %v2682_v29 = vld [vmem:[%s3473_s10 + $0xc0] sm:$0xff] }
 0x1ae   : > { %1639 = vmatpush.bf16.msra.mxu2 %v2682_v29 }
 0x1af   : > { %v1055_v35 = vsub.f32 0.0, %v1054_v33 }
 0x1b1   : > { %v1056_v36 = vmul.f32 1.442695, %v1055_v35  ;;  %v1141_v35 = vld [vmem:[#allocation2 + $0x18] sm:$0xff] }
 0x1b2   : > { %v1050_v37 = vpop.f32.mrf.mxu3 }
 0x1b3   : > { %2760 = vpow2.f32 %v1056_v36  ;;  %v2697_v36 = vld [vmem:[%s3473_s10 + $0xf8] sm:$0xff] }
 0x1b9   : > { %v2761_v25 = vpop.eup %2760 }
 0x1ba   : > { %v1058_v38 = vadd.f32 1.0, %v2761_v25  ;;  %v2696_v25 = vld [vmem:[%s3473_s10 + $0xf0] sm:$0xff] }
 0x1bc   : > { %2762 = vrcp.f32 %v1058_v38  ;;  %v1070_v43 = vand.u32 2147483648, %v1058_v38  ;;  %v1068_v45 = vand.u32 2147483647, %v1058_v38  ;;  %vm1064_vm7 = vweird.f32 %v1058_v38 }
 0x1be   : > { %v1071_v47 = vor.u32 1.1754944e-38, %v1070_v43  ;;  %vm1069_vm9 = vcmp.eq.f32.partialorder %v1068_v45, 8.507059e+37 }
 0x1c2   : > { %v2763_v40 = vpop.eup %2762 }
 0x1c3   : > { %v1060_v41 = vmul.f32 %v2763_v40, %v1058_v38  ;;  %vm1065_vm6 = vweird.f32 %v2763_v40  ;;  %v2695_v38 = vld [vmem:[%s3473_s10 + $0xe8] sm:$0xff] }
 0x1c4   : > { %vm1066_vm8 = vmor %vm1064_vm7, %vm1065_vm6 }
 0x1c5   : > { %v1061_v42 = vsub.f32 1.0, %v1060_v41 }
 0x1c7   : > { %v1062_v44 = vmul.f32 %v2763_v40, %v1061_v42 }
 0x1c9   : > { %v1063_v46 = vadd.f32 %v2763_v40, %v1062_v44 }
 0x1cb   : > { %v1067_v48 = vsel %vm1066_vm8, %v2763_v40, %v1063_v46  ;;  %v2694_v40 = vld [vmem:[%s3473_s10 + $0xe0] sm:$0xff] }
 0x1cc   : > { %v1072_v49 = vsel %vm1069_vm9, %v1071_v47, %v1067_v48 }
 0x1cd   : > { %v1074_v50 = vmul.f32 %v1072_v49, %v1054_v33 }
 0x1cf   : > { %v1075_v51 = vpack.c.bf16 %v1074_v50, %v1074_v50 }
 0x1d1   : > { %2325 = vmatmul.msk.bf16.vlgmr.msrb.gmra.mxu1 %vm687_vm4, %v1075_v51 }
 0x1d2   : > { %1586 = vmatpush.bf16.msrb.mxu1 %v2681_v21 }
 0x1d6   : > { %1587 = vmatpush.bf16.msrb.mxu1 %v2680_v23 }
 0x1da   : > { %1588 = vmatpush.bf16.msrb.mxu1 %v2679_v26 }
 0x1de   : > { %1589 = vmatpush.bf16.msrb.mxu1 %v2678_v28 }
 0x1fe   : > { %v1210_v41 = vpop.f32.mrf.mxu2  ;;  %v1259_v42 = vpop.f32.mrf.mxu3 }
 0x1ff   : > { %1215 = vst.msk [vmem:[#allocation3] sm:$0xff] %vm736_vm0, %v1210_v41 }
 0x200   : > { %1264 = vst.msk [vmem:[#allocation4] sm:$0xff] %vm736_vm0, %v1259_v42 }
 0x206   : > { %v1212_v43 = vpop.f32.mrf.mxu2  ;;  %v1261_v44 = vpop.f32.mrf.mxu3  ;;  %v1414_v62 = vld [vmem:[#allocation3] sm:$0xff] }
 0x207   : > { %1216 = vst.msk [vmem:[#allocation3 + $0x8] sm:$0xff] %vm736_vm0, %v1212_v43  ;;  %v1511_v59 = vld [vmem:[#allocation4] sm:$0xff] }
 0x208   : > { %1265 = vst.msk [vmem:[#allocation4 + $0x8] sm:$0xff] %vm736_vm0, %v1261_v44 }
 0x20e   : > { %v1415_v61 = vld [vmem:[#allocation3 + $0x8] sm:$0xff] }
 0x20f   : > { %v1512_v56 = vld [vmem:[#allocation4 + $0x8] sm:$0xff] }
 0x24e   : > { %v1123_v31 = vpop.f32.mrf.mxu1 }
 0x24f   : > { %v1124_v32 = vadd.f32 %v2758_v30, %v1123_v31 }
 0x251   : > { %1135 = vst.msk [vmem:[#allocation2 + $0x10] sm:$0xff] %vm687_vm4, %v1124_v32 }
 0x256   : > { %v1125_v33 = vpop.f32.mrf.mxu1 }
 0x258   : > { %v3278_v34 = vld [vmem:[#allocation2 + $0x10] sm:$0xff] }
 0x259   : > { %v3284_v37 = vpack.c.bf16 %v1141_v35, %v3278_v34 }
 0x25b   : > { %2392 = vmatmul.msk.bf16.vlgmr.msrb.gmra.mxu0 %vm687_vm4, %v3284_v37  ;;  %2417 = vmatmul.msk.bf16.vlgmr.msra.gmra.mxu1 %vm687_vm4, %v3284_v37 }
 0x25c   : > { %2442 = vmatmul.msk.bf16.vlgmr.msrb.gmra.mxu2 %vm687_vm4, %v3284_v37  ;;  %1784 = vmatpush.bf16.msra.mxu1 %v2697_v36 }
 0x260   : > { %1785 = vmatpush.bf16.msra.mxu1 %v2696_v25 }
 0x264   : > { %1786 = vmatpush.bf16.msra.mxu1 %v2695_v38 }
 0x268   : > { %1787 = vmatpush.bf16.msra.mxu1 %v2694_v40 }
 0x26b   : > { %2475 = vmatmul.msk.bf16.vlgmr.msrb.gmra.mxu1 %vm687_vm4, %v1142_v8 }
 0x26c   : > { %2500 = vmatmul.msk.bf16.vlgmr.msra.gmra.mxu2 %vm687_vm4, %v1142_v8  ;;  %v1148_v8 = vadd.s32 8, %v1147_v6 }
 0x26e   : > { %vm1154_vm14 = vcmp.eq.s32.totalorder %v1148_v8, 8 }
 0x26f   : > { %v1156_v19 = vsel %vm1154_vm14, 1, %v2852_v10 }
 0x270   : > { %vm1158_vm1 = vcmp.le.s32.totalorder %v1152_v18, %v1156_v19 }
 0x271   : > { %vm3351_vm2 = vmand %vm1158_vm1, %vm3342_vm15 }
 0x27b   : > { %2575 = vmatmul.msk.bf16.vlgmr.msra.gmra.mxu1 %vm687_vm4, %v3284_v37 }
 0x2d8   : > { %v1311_v45 = vpop.f32.mrf.mxu0  ;;  %v1360_v46 = vpop.f32.mrf.mxu1 }
 0x2d9   : > { %1316 = vst.msk [vmem:[#allocation3 + $0x10] sm:$0xff] %vm736_vm0, %v1311_v45 }
 0x2da   : > { %1365 = vst.msk [vmem:[#allocation4 + $0x10] sm:$0xff] %vm736_vm0, %v1360_v46 }
 0x2df   : > { %v1409_v47 = vpop.f32.mrf.mxu2 }
 0x2e0   : > { %v1313_v48 = vpop.f32.mrf.mxu0  ;;  %v1362_v49 = vpop.f32.mrf.mxu1  ;;  %v1416_v55 = vld [vmem:[#allocation3 + $0x10] sm:$0xff] }
 0x2e1   : > { %1317 = vst.msk [vmem:[#allocation3 + $0x18] sm:$0xff] %vm736_vm0, %v1313_v48  ;;  %v1513_v54 = vld [vmem:[#allocation4 + $0x10] sm:$0xff] }
 0x2e2   : > { %1366 = vst.msk [vmem:[#allocation4 + $0x18] sm:$0xff] %vm736_vm0, %v1362_v49 }
 0x2e7   : > { %v1411_v50 = vpop.f32.mrf.mxu2 }
 0x2e8   : > { %v1591_v51 = vpop.f32.mrf.mxu1  ;;  %v1417_v52 = vld [vmem:[#allocation3 + $0x18] sm:$0xff] }
 0x2e9   : > { %1597 = vst.msk [vmem:[#allocation3 + $0x20] sm:$0xff] %vm736_vm0, %v1591_v51  ;;  %2443 = vmatpush.xpose.msk.msrb.mxu3 %vm736_vm0, %v1417_v52  ;;  %v1514_v53 = vld [vmem:[#allocation4 + $0x18] sm:$0xff] }
 0x2ea   : > { %1533 = vmatpush.msra.mxu0 %v1514_v53 }
 0x2ec   : > { %1534 = vmatpush.msra.mxu0 %v1513_v54 }
 0x2ed   : > { %2444 = vmatpush.xpose.msk.msrb.mxu3 %vm736_vm0, %v1416_v55  ;;  %v2693_v55 = vld [vmem:[%s3473_s10 + $0x138] sm:$0xff] }
 0x2ee   : > { %1535 = vmatpush.msra.mxu0 %v1512_v56  ;;  %v2692_v56 = vld [vmem:[%s3473_s10 + $0x130] sm:$0xff] }
 0x2ef   : > { %v1641_v57 = vpop.f32.mrf.mxu2 }
 0x2f0   : > { %1647 = vst.msk [vmem:[#allocation4 + $0x20] sm:$0xff] %vm736_vm0, %v1641_v57  ;;  %1536 = vmatpush.msra.mxu0 %v1511_v59  ;;  %v1593_v15 = vpop.f32.mrf.mxu1  ;;  %v1794_v32 = vld [vmem:[#allocation3 + $0x20] sm:$0xff]  ;;  %v2690_v59 = vld [vmem:[%s3473_s10 + $0x120] sm:$0xff] }
 0x2f1   : > { %1598 = vst.msk [vmem:[#allocation3 + $0x28] sm:$0xff] %vm736_vm0, %v1593_v15  ;;  %2445 = vmatpush.xpose.msk.msrb.mxu3 %vm736_vm0, %v1415_v61  ;;  %v2691_v57 = vld [vmem:[%s3473_s10 + $0x128] sm:$0xff] }
 0x2f2   : > { %1735 = vmatpush.bf16.msrb.mxu0 %v2693_v55 }
 0x2f5   : > { %2446 = vmatpush.xpose.msk.msrb.mxu3 %vm736_vm0, %v1414_v62 }
 0x2f6   : > { %1736 = vmatpush.bf16.msrb.mxu0 %v2692_v56 }
 0x2f7   : > { %v1643_v1 = vpop.f32.mrf.mxu2 }
 0x2f8   : > { %1648 = vst.msk [vmem:[#allocation4 + $0x28] sm:$0xff] %vm736_vm0, %v1643_v1  ;;  %2447 = vmatmul.msk.f32.vlgmr.msrb.gmra.mxu3 %vm736_vm0, %v1409_v47  ;;  %v1795_v31 = vld [vmem:[#allocation3 + $0x28] sm:$0xff]  ;;  %v1789_v33 = vpop.f32.mrf.mxu1 }
 0x2f9   : > { %1686 = vmatpush.bf16.msra.mxu3 %v2689_v60 }
 0x2fa   : > { %1737 = vmatpush.bf16.msrb.mxu0 %v2691_v57 }
 0x2fd   : > { %1687 = vmatpush.bf16.msra.mxu3 %v2688_v63 }
 0x2fe   : > { %1738 = vmatpush.bf16.msrb.mxu0 %v2690_v59 }
 0x300   : > { %2448 = vmatmul.msk.f32.gmra.mxu3 %vm736_vm0, %v1411_v50  ;;  %v1791_v35 = vpop.f32.mrf.mxu1 }
 0x301   : > { %1688 = vmatpush.bf16.msra.mxu3 %v2687_v2 }
 0x305   : > { %1689 = vmatpush.bf16.msra.mxu3 %v2686_v3 }
 0x308   : > { %2525 = vmatmul.msk.bf16.vlgmr.msra.gmra.mxu3 %vm687_vm4, %v3284_v37 }
 0x37b   : > { %v1453_v11 = vpop.f32.mrf.mxu3 }
 0x37c   : > { %v1459_v16 = vmul.f32 0.17677669, %v1453_v11 }
 0x37e   : > { %v1461_v20 = vsel %vm3342_vm15, %v1459_v16, -2.3819763e+38 }
 0x37f   : > { %v1463_v0 = vsel %vm736_vm0, %v1461_v20, -inf }
 0x380   : > { %1464 = vmax.xlane.f32.xlu1 %v1463_v0 }
 0x383   : > { %v1456_v21 = vpop.f32.mrf.mxu3 }
 0x384   : > { %v1460_v23 = vmul.f32 0.17677669, %v1456_v21 }
 0x386   : > { %v1462_v24 = vsel %vm3351_vm2, %v1460_v23, -2.3819763e+38 }
 0x387   : > { %v1466_v26 = vsel %vm736_vm0, %v1462_v24, -inf }
 0x388   : > { %1467 = vmax.xlane.f32.xlu2 %v1466_v26 }
 0x38b   : > { %v1691_v27 = vpop.f32.mrf.mxu3 }
 0x38c   : > { %1696 = vst.msk [vmem:[#allocation3 + $0x30] sm:$0xff] %vm736_vm0, %v1691_v27 }
 0x393   : > { %v1693_v28 = vpop.f32.mrf.mxu3  ;;  %v1796_v30 = vld [vmem:[#allocation3 + $0x30] sm:$0xff] }
 0x394   : > { %1697 = vst.msk [vmem:[#allocation3 + $0x38] sm:$0xff] %vm736_vm0, %v1693_v28 }
 0x39b   : > { %v1797_v29 = vld [vmem:[#allocation3 + $0x38] sm:$0xff] }
 0x39c   : > { %2576 = vmatpush.xpose.msk.msrb.mxu2 %vm736_vm0, %v1797_v29 }
 0x3a0   : > { %2577 = vmatpush.xpose.msk.msrb.mxu2 %vm736_vm0, %v1796_v30 }
 0x3a4   : > { %2578 = vmatpush.xpose.msk.msrb.mxu2 %vm736_vm0, %v1795_v31 }
 0x3a8   : > { %2579 = vmatpush.xpose.msk.msrb.mxu2 %vm736_vm0, %v1794_v32  ;;  %v2676_v32 = vld [vmem:[%s3474_s11] sm:$0xff] }
 0x3ab   : > { %2580 = vmatmul.msk.f32.vlgmr.msrb.gmra.mxu2 %vm736_vm0, %v1789_v33 }
 0x3b3   : > { %2581 = vmatmul.msk.f32.gmra.mxu2 %vm736_vm0, %v1791_v35 }
 0x3f3   : > { %v1465_v36 = vpop.xlane.xlu1 %1464 }
 0x3f4   : > { %v1469_v25 = vsub.f32 %v1461_v20, %v1465_v36 }
 0x3f6   : > { %v1471_v38 = vmul.f32 1.442695, %v1469_v25 }
 0x3f8   : > { %2764 = vpow2.f32 %v1471_v38 }
 0x3fb   : > { %v1468_v40 = vpop.xlane.xlu2 %1467 }
 0x3fc   : > { %v1470_v41 = vsub.f32 %v1462_v24, %v1468_v40 }
 0x3fe   : > { %v2765_v42 = vpop.eup %2764  ;;  %v1473_v43 = vmul.f32 1.442695, %v1470_v41 }
 0x3ff   : > { %v1475_v44 = vsel %vm736_vm0, %v2765_v42, 0.0 }
 0x400   : > { %2766 = vpow2.f32 %v1473_v43  ;;  %1476 = vadd.xlane.f32.xlu2 %v1475_v44  ;;  %v1892_v43 = vld [vmem:[#allocation4 + $0x28] sm:$0xff]  ;;  %v1891_v44 = vld [vmem:[#allocation4 + $0x20] sm:$0xff] }
 0x406   : > { %v2767_v45 = vpop.eup %2766 }
 0x407   : > { %v1478_v46 = vsel %vm736_vm0, %v2767_v45, 0.0 }
 0x408   : > { %1479 = vadd.xlane.f32.xlu0 %v1478_v46 }
 0x42e   : > { %v1833_v47 = vpop.f32.mrf.mxu2 }
 0x42f   : > { %v1839_v48 = vmul.f32 0.17677669, %v1833_v47 }
 0x431   : > { %v1841_v49 = vsel %vm3342_vm15, %v1839_v48, -2.3819763e+38 }
 0x432   : > { %v1843_v50 = vsel %vm736_vm0, %v1841_v49, -inf }
 0x433   : > { %1844 = vmax.xlane.f32.xlu2 %v1843_v50 }
 0x436   : > { %v1836_v51 = vpop.f32.mrf.mxu2 }
 0x437   : > { %v1840_v52 = vmul.f32 0.17677669, %v1836_v51 }
 0x439   : > { %v1842_v53 = vsel %vm3351_vm2, %v1840_v52, -2.3819763e+38 }
 0x43a   : > { %v1846_v54 = vsel %vm736_vm0, %v1842_v53, -inf }
 0x43b   : > { %1847 = vmax.xlane.f32.xlu2 %v1846_v54 }
 0x473   : > { %v1477_v15 = vpop.xlane.xlu2 %1476 }
 0x474   : > { %2768 = vrcp.f32 %v1477_v15  ;;  %v1492_v1 = vand.u32 2147483648, %v1477_v15  ;;  %v1490_v3 = vand.u32 2147483647, %v1477_v15  ;;  %vm1486_vm5 = vweird.f32 %v1477_v15 }
 0x476   : > { %v1493_v6 = vor.u32 1.1754944e-38, %v1492_v1  ;;  %vm1491_vm7 = vcmp.eq.f32.partialorder %v1490_v3, 8.507059e+37 }
 0x47a   : > { %v2769_v61 = vpop.eup %2768 }
 0x47b   : > { %v1482_v60 = vmul.f32 %v2769_v61, %v1477_v15  ;;  %v1480_v62 = vpop.xlane.xlu0 %1479  ;;  %vm1487_vm3 = vweird.f32 %v2769_v61 }
 0x47c   : > { %2770 = vrcp.f32 %v1480_v62  ;;  %vm1488_vm6 = vmor %vm1486_vm5, %vm1487_vm3  ;;  %v1507_v58 = vand.u32 2147483648, %v1480_v62  ;;  %v1505_v12 = vand.u32 2147483647, %v1480_v62  ;;  %vm1501_vm9 = vweird.f32 %v1480_v62 }
 0x47d   : > { %v1483_v63 = vsub.f32 1.0, %v1482_v60 }
 0x47e   : > { %v1508_v18 = vor.u32 1.1754944e-38, %v1507_v58  ;;  %vm1506_vm11 = vcmp.eq.f32.partialorder %v1505_v12, 8.507059e+37  ;;  %v2701_v12 = vld [vmem:[%s3475_s12 + $0x8] sm:$0xff] }
 0x47f   : > { %v1484_v2 = vmul.f32 %v2769_v61, %v1483_v63 }
 0x481   : > { %v1485_v4 = vadd.f32 %v2769_v61, %v1484_v2 }
 0x482   : > { %v2771_v5 = vpop.eup %2770 }
 0x483   : > { %v1489_v39 = vsel %vm1488_vm6, %v2769_v61, %v1485_v4  ;;  %v1497_v7 = vmul.f32 %v2771_v5, %v1480_v62  ;;  %vm1502_vm8 = vweird.f32 %v2771_v5 }
 0x484   : > { %v1494_v8 = vsel %vm1491_vm7, %v1493_v6, %v1489_v39  ;;  %vm1503_vm10 = vmor %vm1501_vm9, %vm1502_vm8 }
 0x485   : > { %v1498_v9 = vsub.f32 1.0, %v1497_v7  ;;  %v1495_v10 = vmul.f32 %v2765_v42, %v1494_v8  ;;  %v2698_v7 = vld [vmem:[%s3474_s11 + $0x10] sm:$0xff]  ;;  %v2703_v8 = vld [vmem:[%s3475_s12 + $0x18] sm:$0xff] }
 0x486   : > { %2029 = vmatpush.bf16.msra.mxu2 %v2703_v8 }
 0x487   : > { %v1499_v11 = vmul.f32 %v2771_v5, %v1498_v9  ;;  %2449 = vmatmul.msk.f32.vlgmr.msra.gmra.mxu0 %vm736_vm0, %v1495_v10  ;;  %v2702_v9 = vld [vmem:[%s3475_s12 + $0x10] sm:$0xff] }
 0x489   : > { %v1500_v16 = vadd.f32 %v2771_v5, %v1499_v11 }
 0x48a   : > { %2030 = vmatpush.bf16.msra.mxu2 %v2702_v9 }
 0x48b   : > { %v1504_v19 = vsel %vm1503_vm10, %v2771_v5, %v1500_v16  ;;  %v2699_v5 = vld [vmem:[%s3474_s11 + $0x18] sm:$0xff]  ;;  %v2700_v16 = vld [vmem:[%s3475_s12] sm:$0xff] }
 0x48c   : > { %v1509_v20 = vsel %vm1506_vm11, %v1508_v18, %v1504_v19  ;;  %1951 = vmatpush.bf16.msra.mxu0 %v2699_v5 }
 0x48d   : > { %v1510_v0 = vmul.f32 %v2767_v45, %v1509_v20 }
 0x48e   : > { %2031 = vmatpush.bf16.msra.mxu2 %v2701_v12 }
 0x48f   : > { %2450 = vmatmul.msk.f32.gmra.mxu0 %vm736_vm0, %v1510_v0 }
 0x490   : > { %1952 = vmatpush.bf16.msra.mxu0 %v2698_v7 }
 0x492   : > { %2032 = vmatpush.bf16.msra.mxu2 %v2700_v16 }
 0x497   : > { %2550 = vmatmul.msk.bf16.vlgmr.msrb.gmra.mxu0 %vm687_vm4, %v3284_v37  ;;  %v2677_v37 = vld [vmem:[%s3474_s11 + $0x8] sm:$0xff] }
 0x498   : > { %1979 = vmatpush.bf16.msrb.mxu1 %v2677_v37 }
 0x49c   : > { %1980 = vmatpush.bf16.msrb.mxu1 %v2676_v32 }
 0x4a6   : > { %v1845_v21 = vpop.xlane.xlu2 %1844 }
 0x4a7   : > { %v1849_v22 = vsub.f32 %v1841_v49, %v1845_v21 }
 0x4a9   : > { %v1851_v23 = vmul.f32 1.442695, %v1849_v22  ;;  %v2759_v22 = vld [vmem:[%s3476_s13 + $0x7] ss:$0 sm:$0xff] }
 0x4ab   : > { %2772 = vpow2.f32 %v1851_v23 }
 0x4ae   : > { %v1848_v24 = vpop.xlane.xlu2 %1847 }
 0x4af   : > { %v1850_v26 = vsub.f32 %v1842_v53, %v1848_v24 }
 0x4b1   : > { %v2773_v27 = vpop.eup %2772  ;;  %v1853_v28 = vmul.f32 1.442695, %v1850_v26 }
 0x4b2   : > { %v1855_v29 = vsel %vm736_vm0, %v2773_v27, 0.0 }
 0x4b3   : > { %2774 = vpow2.f32 %v1853_v28  ;;  %1856 = vadd.xlane.f32.xlu2 %v1855_v29 }
 0x4b9   : > { %v2775_v30 = vpop.eup %2774 }
 0x4ba   : > { %v1858_v31 = vsel %vm736_vm0, %v2775_v30, 0.0 }
 0x4bb   : > { %1859 = vadd.xlane.f32.xlu2 %v1858_v31 }
 0x504   : > { %v1538_v33 = vpop.f32.mrf.mxu0 }
 0x50c   : > { %v1541_v35 = vpop.f32.mrf.mxu0 }
 0x50d   : > { %v1544_v36 = vpack.c.bf16 %v1541_v35, %v1538_v33 }
 0x50f   : > { %2605 = vmatmul.msk.bf16.vlgmr.msrb.gmra.mxu1 %vm736_vm0, %v1544_v36 }
 0x514   : > { %v1740_v25 = vpop.f32.mrf.mxu0 }
 0x515   : > { %1745 = vst.msk [vmem:[#allocation4 + $0x30] sm:$0xff] %vm736_vm0, %v1740_v25 }
 0x51c   : > { %v1742_v38 = vpop.f32.mrf.mxu0  ;;  %v1893_v42 = vld [vmem:[#allocation4 + $0x30] sm:$0xff] }
 0x51d   : > { %1746 = vst.msk [vmem:[#allocation4 + $0x38] sm:$0xff] %vm736_vm0, %v1742_v38 }
 0x524   : > { %v1894_v40 = vld [vmem:[#allocation4 + $0x38] sm:$0xff] }
 0x525   : > { %1913 = vmatpush.msrb.mxu3 %v1894_v40 }
 0x526   : > { %v1857_v41 = vpop.xlane.xlu2 %1856 }
 0x527   : > { %2776 = vrcp.f32 %v1857_v41  ;;  %1914 = vmatpush.msrb.mxu3 %v1893_v42  ;;  %v1872_v49 = vand.u32 2147483648, %v1857_v41  ;;  %v1870_v51 = vand.u32 2147483647, %v1857_v41  ;;  %vm1866_vm13 = vweird.f32 %v1857_v41 }
 0x529   : > { %1915 = vmatpush.msrb.mxu3 %v1892_v43  ;;  %v1873_v54 = vor.u32 1.1754944e-38, %v1872_v49  ;;  %vm1871_vm15 = vcmp.eq.f32.partialorder %v1870_v51, 8.507059e+37 }
 0x52b   : > { %1916 = vmatpush.msrb.mxu3 %v1891_v44 }
 0x52d   : > { %v2777_v45 = vpop.eup %2776 }
 0x52e   : > { %v1862_v46 = vmul.f32 %v2777_v45, %v1857_v41  ;;  %v1860_v47 = vpop.xlane.xlu2 %1859  ;;  %vm1867_vm12 = vweird.f32 %v2777_v45 }
 0x52f   : > { %2778 = vrcp.f32 %v1860_v47  ;;  %vm1868_vm14 = vmor %vm1866_vm13, %vm1867_vm12  ;;  %v1887_v61 = vand.u32 2147483648, %v1860_v47  ;;  %v1885_v62 = vand.u32 2147483647, %v1860_v47  ;;  %vm1881_vm2 = vweird.f32 %v1860_v47 }
 0x530   : > { %v1863_v48 = vsub.f32 1.0, %v1862_v46 }
 0x531   : > { %v1888_v1 = vor.u32 1.1754944e-38, %v1887_v61  ;;  %vm1886_vm5 = vcmp.eq.f32.partialorder %v1885_v62, 8.507059e+37 }
 0x532   : > { %v1864_v50 = vmul.f32 %v2777_v45, %v1863_v48 }
 0x534   : > { %v1865_v52 = vadd.f32 %v2777_v45, %v1864_v50 }
 0x535   : > { %v2779_v53 = vpop.eup %2778 }
 0x536   : > { %v1869_v55 = vsel %vm1868_vm14, %v2777_v45, %v1865_v52  ;;  %v1877_v56 = vmul.f32 %v2779_v53, %v1860_v47  ;;  %vm1882_vm1 = vweird.f32 %v2779_v53 }
 0x537   : > { %v1874_v57 = vsel %vm1871_vm15, %v1873_v54, %v1869_v55  ;;  %vm1883_vm3 = vmor %vm1881_vm2, %vm1882_vm1 }
 0x538   : > { %v1878_v59 = vsub.f32 1.0, %v1877_v56  ;;  %v1875_v15 = vmul.f32 %v2773_v27, %v1874_v57 }
 0x53a   : > { %v1879_v60 = vmul.f32 %v2779_v53, %v1878_v59  ;;  %2582 = vmatmul.msk.f32.vlgmr.msrb.gmra.mxu3 %vm736_vm0, %v1875_v15 }
 0x53c   : > { %v1880_v63 = vadd.f32 %v2779_v53, %v1879_v60 }
 0x53e   : > { %v1884_v2 = vsel %vm1883_vm3, %v2779_v53, %v1880_v63 }
 0x53f   : > { %v1889_v3 = vsel %vm1886_vm5, %v1888_v1, %v1884_v2 }
 0x540   : > { %v1890_v4 = vmul.f32 %v2775_v30, %v1889_v3 }
 0x542   : > { %2583 = vmatmul.msk.f32.gmra.mxu3 %vm736_vm0, %v1890_v4 }
 0x58c   : > { %v1982_v6 = vpop.f32.mrf.mxu1 }
 0x594   : > { %v1984_v39 = vpop.f32.mrf.mxu1 }
 0x5bd   : > { %v1918_v10 = vpop.f32.mrf.mxu3 }
 0x5c5   : > { %v1921_v58 = vpop.f32.mrf.mxu3 }
 0x5c6   : > { %v1924_v11 = vpack.c.bf16 %v1921_v58, %v1918_v10 }
 0x5c8   : > { %2596 = vmatmul.msk.bf16.vlgmr.msra.gmra.mxu0 %vm736_vm0, %v1924_v11 }
 0x645   : > { %v1954_v18 = vpop.f32.mrf.mxu0 }
 0x646   : > { %v1983_v19 = vadd.f32 %v1982_v6, %v1954_v18 }
 0x648   : > { %v1986_v20 = vadd.f32 %v1983_v19, %v3278_v34 }
 0x64a   : > { %v1987_v0 = vpack.c.bf16 %v1986_v20, %v1986_v20 }
 0x64c   : > { %2622 = vmatmul.msk.bf16.vlgmr.msra.gmra.mxu2 %vm687_vm4, %v1987_v0 }
 0x64d   : > { %v1956_v21 = vpop.f32.mrf.mxu0 }
 0x6cf   : > { %v2034_v23 = vpop.f32.mrf.mxu2 }
 0x6d0   : > { %v2035_v24 = vadd.f32 %v2759_v22, %v2034_v23 }
 0x6d2   : > { %v2038_v34 = vsub.f32 %v579_v17, %v2035_v24 }
 0x6d4   : > { %v2039_v26 = vmul.f32 %v2038_v34, %v2038_v34 }
 0x6d6   : > { %2040 = vst.msk [vmem:[%s532_s6] sm:$0xff] %vm736_vm0, %v2039_v26 }
 0x6d7   : > { %v2036_v27 = vpop.f32.mrf.mxu2 }
 0x6d8   : > { %2807 = shalt.err (!%p2804_p3)
}
 0x6d9   : > { %2704 = dma.vmem_to_hbm [thread:$0]  (%p2966_p5), %s2055_s26, 128, %s2057_s24, %s2042_s17  }
 0x6da PF: > { %s3500_s21 = sld [smem:[#allocation10_spill]] }
 0x6db   : > { %s3501_s20 = sld [smem:[#allocation8_spill]] }
 0x6e0   : > { %p2710_p4 = scmp.ge.s32.totalorder %s3500_s21, 2 }
 0x6e1   : > { %s2068_s19 = sand.u32 1, %s3501_s20  }
 0x6e2   : > { %p2707_p7 = pnand %p2710_p4, %p2970_p6  ;;  %s2069_s6 = scalar_lea.sflag [#allocation6], %s2068_s19 }
 0x6e4   : > { %p2708_p8 = pneg %p2707_p7 }
 0x6e6   : > { %2825 = dma.done.wait (%p2708_p8), %s2069_s6, 128  }
 0x6e7   : > { %2827 = vsyncadd (%p2708_p8), %s2069_s6, 4294967168  ;;  %s3503_s16 = sld [smem:[#allocation11_spill]]  ;;  %s3506_s29 = smov %s2834_s30 }
 0x6e8   : > { %s3504_s22 = sld [smem:[#allocation9_spill]] }
 0x6e9   : > { %s3505_s15 = sld [smem:[#allocation12_spill]] }
 0x6ed   : > { %p24_p9 = scmp.ge.s32.totalorder %s3503_s16, 4  }
 0x6ee   : > { %s3507_s30 = smov %s3504_s22 }
 0x6ef   :  { %26 = sbr.rel (!%p24_p9) target bundleno = 5 (0x5), region = 143 }
 0x6f4   :  { %2075 = vsyncpa [#allocation6], 1 }
 0x6f5   :  { %2077 = vsyncpa [#allocation6 + $0x1], 1 }

</bundles_post_ra>
